<compile_context>
chip_gen: v7x
topology: tpu7x:2x2x1
jax: 0.10.0
libtpu: 0.0.40
codegen_flags: <defaults>
</compile_context>

<pallas_src>
import jax
import jax.numpy as jnp
from jax.experimental import pallas as pl
from jax.experimental.pallas import tpu as pltpu


_N_LAYER_REFS = 4  # wi (D_in,3H) bf16, wh (H,3H) bf16, bi (1,3H) f32, bhn (1,3H) f32


def _make_fused_kernel(layer_dim, T, B, H):
    """Build the fused GRU_V2 forward kernel (closure over static dims)."""
    eps = 1e-5
    H2 = 2 * H
    H3 = 3 * H

    def kernel(*refs):
        x_ref = refs[0]                        # (T, B, D_in) f32, time-major
        h0_ref = refs[1]                       # (layer_dim, B, H) f32
        pos = 2
        layer_refs = []
        for _ in range(layer_dim):
            layer_refs.append(refs[pos:pos + _N_LAYER_REFS])
            pos += _N_LAYER_REFS
        (bn1_g_ref, bn1_b_ref, w1_ref, fb1_ref,
         bn2_g_ref, bn2_b_ref, w2_ref, fb2_ref) = refs[pos:pos + 8]
        o_ref = refs[pos + 8]                  # (B, output_dim)

        # Per-timestep input slabs: leading-axis loads of whole aligned (B, D) tiles.
        seq = [x_ref[t] for t in range(T)]     # list of (B, D_in) f32

        h = None
        for l in range(layer_dim):
            wi_ref, wh_ref, bi_ref, bhn_ref = layer_refs[l]
            wi = wi_ref[...]                               # (D_in, 3H) bf16, cols [r|z|n]
            wh = wh_ref[...]                               # (H, 3H)    bf16, cols [r|z|n]
            bi = jnp.broadcast_to(bi_ref[...], (B, H3))    # [b_ir+b_hr | b_iz+b_hz | b_in]
            bh = jnp.broadcast_to(bhn_ref[...], (B, H3))   # [0 | 0 | b_hn]  (hoisted bcast)

            # Hoisted input projections (no recurrent dependency): one fused-gate
            # (B, D_in) x (D_in, 3H) bf16 matmul per timestep, all independent, so they
            # pipeline through the MXU off the serial h-chain.  Results stay in vregs.
            gi = [jnp.dot(seq[t].astype(jnp.bfloat16), wi,
                          preferred_element_type=jnp.float32) + bi
                  for t in range(T)]

            h = h0_ref[l]                                  # (B, H) f32
            out_seq = []
            # Serial recurrence, fully unrolled (T small & static).  Only the single
            # fused h @ Wh dot + gate math sits on the serial critical path.
            for t in range(T):
                gh = jnp.dot(h.astype(jnp.bfloat16), wh,
                             preferred_element_type=jnp.float32) + bh     # (B, 3H)
                g = gi[t]
                rz = jax.nn.sigmoid(g[:, :H2] + gh[:, :H2])               # (B, 2H)
                r = rz[:, :H]
                z = rz[:, H:]
                n = jnp.tanh(g[:, H2:] + r * gh[:, H2:])
                h = n + z * (h - n)                        # == (1 - z) * n + z * h
                if l < layer_dim - 1:
                    out_seq.append(h)                      # next layer's input, vreg-resident
            seq = out_seq

        # h == last layer's hidden at t = T-1  ==  out[:, -1, :]
        # ---- head: BN1 -> fc1 -> ReLU -> BN2 -> fc2 (tiny, kept in f32) --------
        # TODO(synk): BatchNorm1d uses batch statistics (training-mode forward);
        # eval-mode running_mean/running_var is not implemented.
        mean1 = jnp.mean(h, axis=0, keepdims=True)
        var1 = jnp.mean((h - mean1) ** 2, axis=0, keepdims=True)
        xn = (h - mean1) * jax.lax.rsqrt(var1 + eps) * bn1_g_ref[...] + bn1_b_ref[...]

        y = jnp.dot(xn, w1_ref[...], preferred_element_type=jnp.float32) + fb1_ref[...]
        y = jnp.maximum(y, 0.0)                # ReLU

        mean2 = jnp.mean(y, axis=0, keepdims=True)
        var2 = jnp.mean((y - mean2) ** 2, axis=0, keepdims=True)
        yn = (y - mean2) * jax.lax.rsqrt(var2 + eps) * bn2_g_ref[...] + bn2_b_ref[...]

        o_ref[...] = jnp.dot(yn, w2_ref[...],
                             preferred_element_type=jnp.float32) + fb2_ref[...]

    return kernel


def _full_spec(shape):
    zeros = (0,) * len(shape)
    return pl.BlockSpec(shape, lambda i: zeros)


def gru_v2_fused(x_tm, h0, gru_params, head_params):
    """x_tm: (T, B, D) f32 time-major, h0: (layer_dim, B, H) f32 -> (B, output_dim) f32."""
    T, B, _ = x_tm.shape
    L, _, H = h0.shape
    O = head_params["fc2_w_t"].shape[1]

    inputs = [x_tm, h0]
    for p in gru_params:
        inputs += [p["wi"], p["wh"], p["bi"], p["bhn"]]
    inputs += [head_params["bn1_g"], head_params["bn1_b"],
               head_params["fc1_w_t"], head_params["fc1_b"],
               head_params["bn2_g"], head_params["bn2_b"],
               head_params["fc2_w_t"], head_params["fc2_b"]]

    kernel = _make_fused_kernel(L, T, B, H)

    return pl.pallas_call(
        kernel,
        out_shape=jax.ShapeDtypeStruct((B, O), jnp.float32),
        grid_spec=pltpu.PrefetchScalarGridSpec(
            num_scalar_prefetch=0,
            grid=(1,),
            in_specs=[_full_spec(a.shape) for a in inputs],
            out_specs=_full_spec((B, O)),
        ),
        compiler_params=pltpu.CompilerParams(
            dimension_semantics=("arbitrary",)),
    )(*inputs)


def init_params(key, input_dim, hidden_dim, layer_dim, output_dim, middle_dim=24):
    H = hidden_dim
    scale = 1.0 / float(hidden_dim) ** 0.5
    keys = jax.random.split(key, 4 * layer_dim + 4)
    ki = 0
    gru = []
    for l in range(layer_dim):
        in_l = input_dim if l == 0 else hidden_dim
        w_ih = jax.random.uniform(keys[ki], (3 * H, in_l), minval=-scale, maxval=scale); ki += 1
        w_hh = jax.random.uniform(keys[ki], (3 * H, H), minval=-scale, maxval=scale); ki += 1
        b_ih = jax.random.uniform(keys[ki], (3 * H,), minval=-scale, maxval=scale); ki += 1
        b_hh = jax.random.uniform(keys[ki], (3 * H,), minval=-scale, maxval=scale); ki += 1
        # PyTorch gate stacking is [r, z, n].  Fuse per-layer into single (D_in, 3H) and
        # (H, 3H) bf16 matrices (columns ordered [r | z | n]); fold the r/z biases
        # (b_ir + b_hr, b_iz + b_hz) into the input-projection bias, keep b_hn separate
        # because the n gate needs r * (W_hn h + b_hn).
        bi = jnp.concatenate([b_ih[0:H] + b_hh[0:H],
                              b_ih[H:2 * H] + b_hh[H:2 * H],
                              b_ih[2 * H:3 * H]]).reshape(1, 3 * H)
        bhn = jnp.concatenate([jnp.zeros((2 * H,), jnp.float32),
                               b_hh[2 * H:3 * H]]).reshape(1, 3 * H)
        gru.append(dict(
            wi=w_ih.T.astype(jnp.bfloat16),
            wh=w_hh.T.astype(jnp.bfloat16),
            bi=bi.astype(jnp.float32),
            bhn=bhn.astype(jnp.float32),
        ))

    s1 = 1.0 / float(hidden_dim) ** 0.5
    fc1_w = jax.random.uniform(keys[ki], (middle_dim, hidden_dim), minval=-s1, maxval=s1); ki += 1
    fc1_b = jax.random.uniform(keys[ki], (middle_dim,), minval=-s1, maxval=s1); ki += 1
    s2 = 1.0 / float(middle_dim) ** 0.5
    fc2_w = jax.random.uniform(keys[ki], (output_dim, middle_dim), minval=-s2, maxval=s2); ki += 1
    fc2_b = jax.random.uniform(keys[ki], (output_dim,), minval=-s2, maxval=s2); ki += 1

    head = dict(
        fc1_w_t=fc1_w.T, fc1_b=fc1_b.reshape(1, -1),
        fc2_w_t=fc2_w.T, fc2_b=fc2_b.reshape(1, -1),
        # BatchNorm affine params (PyTorch default init: gamma=1, beta=0)
        bn1_g=jnp.ones((1, hidden_dim), jnp.float32),
        bn1_b=jnp.zeros((1, hidden_dim), jnp.float32),
        bn2_g=jnp.ones((1, middle_dim), jnp.float32),
        bn2_b=jnp.zeros((1, middle_dim), jnp.float32),
    )
    return {"gru": gru, "head": head}


@jax.jit
def gru_v2_forward(params, x, h0):
    """x: (B, T, input_dim), h0: (layer_dim, B, hidden_dim) -> (B, output_dim)."""
    # Host-side time-major transpose: fuses into the HBM->VMEM feed of the pallas_call,
    # so the kernel never pays for a reorder.
    x_tm = jnp.transpose(x.astype(jnp.float32), (1, 0, 2))
    return gru_v2_fused(x_tm, h0.astype(jnp.float32),
                        params["gru"], params["head"])


if __name__ == "__main__":
    input_dim, hidden_dim, layer_dim, output_dim = 8, 32, 2, 4
    B, T = 2, 8

    key = jax.random.PRNGKey(0)
    k_param, k_x = jax.random.split(key)
    params = init_params(k_param, input_dim, hidden_dim, layer_dim, output_dim)

    x = jax.random.normal(k_x, (B, T, input_dim), dtype=jnp.float32)
    h0 = jnp.zeros((layer_dim, B, hidden_dim), dtype=jnp.float32)  # init_hidden

    out = gru_v2_forward(params, x, h0)
    jax.block_until_ready(out)
    assert out.shape == (B, output_dim)
    print("KERNEL_OK")
</pallas_src>

<mosaic_0001>
module attributes {stable_mosaic.version = 11 : i64} {
  func.func @kernel(%arg0: i32, %arg1: memref<8x2x8xf32, #tpu.memory_space<vmem>>, %arg2: memref<2x2x32xf32, #tpu.memory_space<vmem>>, %arg3: memref<8x96xbf16, #tpu.memory_space<vmem>>, %arg4: memref<32x96xbf16, #tpu.memory_space<vmem>>, %arg5: memref<1x96xf32, #tpu.memory_space<vmem>>, %arg6: memref<1x96xf32, #tpu.memory_space<vmem>>, %arg7: memref<32x96xbf16, #tpu.memory_space<vmem>>, %arg8: memref<32x96xbf16, #tpu.memory_space<vmem>>, %arg9: memref<1x96xf32, #tpu.memory_space<vmem>>, %arg10: memref<1x96xf32, #tpu.memory_space<vmem>>, %arg11: memref<1x32xf32, #tpu.memory_space<vmem>>, %arg12: memref<1x32xf32, #tpu.memory_space<vmem>>, %arg13: memref<32x24xf32, #tpu.memory_space<vmem>>, %arg14: memref<1x24xf32, #tpu.memory_space<vmem>>, %arg15: memref<1x24xf32, #tpu.memory_space<vmem>>, %arg16: memref<1x24xf32, #tpu.memory_space<vmem>>, %arg17: memref<24x4xf32, #tpu.memory_space<vmem>>, %arg18: memref<1x4xf32, #tpu.memory_space<vmem>>, %arg19: memref<2x4xf32, #tpu.memory_space<vmem>>) attributes {dimension_semantics = [#tpu.dimension_semantics<arbitrary>], iteration_bounds = array<i64: 1>, scalar_prefetch = 0 : i64, scratch_operands = 0 : i64, tpu.core_type = #tpu.core_type<tc>, window_params = [{pipeline_mode = #tpu.pipeline_mode<synchronous>, transform_indices = @transform_0, window_bounds = array<i64: 8, 2, 8>}, {pipeline_mode = #tpu.pipeline_mode<synchronous>, transform_indices = @transform_1, window_bounds = array<i64: 2, 2, 32>}, {pipeline_mode = #tpu.pipeline_mode<synchronous>, transform_indices = @transform_2, window_bounds = array<i64: 8, 96>}, {pipeline_mode = #tpu.pipeline_mode<synchronous>, transform_indices = @transform_3, window_bounds = array<i64: 32, 96>}, {pipeline_mode = #tpu.pipeline_mode<synchronous>, transform_indices = @transform_4, window_bounds = array<i64: 1, 96>}, {pipeline_mode = #tpu.pipeline_mode<synchronous>, transform_indices = @transform_5, window_bounds = array<i64: 1, 96>}, {pipeline_mode = #tpu.pipeline_mode<synchronous>, transform_indices = @transform_6, window_bounds = array<i64: 32, 96>}, {pipeline_mode = #tpu.pipeline_mode<synchronous>, transform_indices = @transform_7, window_bounds = array<i64: 32, 96>}, {pipeline_mode = #tpu.pipeline_mode<synchronous>, transform_indices = @transform_8, window_bounds = array<i64: 1, 96>}, {pipeline_mode = #tpu.pipeline_mode<synchronous>, transform_indices = @transform_9, window_bounds = array<i64: 1, 96>}, {pipeline_mode = #tpu.pipeline_mode<synchronous>, transform_indices = @transform_10, window_bounds = array<i64: 1, 32>}, {pipeline_mode = #tpu.pipeline_mode<synchronous>, transform_indices = @transform_11, window_bounds = array<i64: 1, 32>}, {pipeline_mode = #tpu.pipeline_mode<synchronous>, transform_indices = @transform_12, window_bounds = array<i64: 32, 24>}, {pipeline_mode = #tpu.pipeline_mode<synchronous>, transform_indices = @transform_13, window_bounds = array<i64: 1, 24>}, {pipeline_mode = #tpu.pipeline_mode<synchronous>, transform_indices = @transform_14, window_bounds = array<i64: 1, 24>}, {pipeline_mode = #tpu.pipeline_mode<synchronous>, transform_indices = @transform_15, window_bounds = array<i64: 1, 24>}, {pipeline_mode = #tpu.pipeline_mode<synchronous>, transform_indices = @transform_16, window_bounds = array<i64: 24, 4>}, {pipeline_mode = #tpu.pipeline_mode<synchronous>, transform_indices = @transform_17, window_bounds = array<i64: 1, 4>}, {pipeline_mode = #tpu.pipeline_mode<synchronous>, transform_indices = @transform_18, window_bounds = array<i64: 2, 4>}]} {
    %c0 = arith.constant 0 : index
    %c0_0 = arith.constant 0 : index
    %c0_1 = arith.constant 0 : index
    %0 = vector.load %arg1[%c0, %c0_0, %c0_1] : memref<8x2x8xf32, #tpu.memory_space<vmem>>, vector<1x2x8xf32>
    %1 = vector.shape_cast %0 : vector<1x2x8xf32> to vector<2x8xf32>
    %c1 = arith.constant 1 : index
    %c0_2 = arith.constant 0 : index
    %c0_3 = arith.constant 0 : index
    %2 = vector.load %arg1[%c1, %c0_2, %c0_3] : memref<8x2x8xf32, #tpu.memory_space<vmem>>, vector<1x2x8xf32>
    %3 = vector.shape_cast %2 : vector<1x2x8xf32> to vector<2x8xf32>
    %c2 = arith.constant 2 : index
    %c0_4 = arith.constant 0 : index
    %c0_5 = arith.constant 0 : index
    %4 = vector.load %arg1[%c2, %c0_4, %c0_5] : memref<8x2x8xf32, #tpu.memory_space<vmem>>, vector<1x2x8xf32>
    %5 = vector.shape_cast %4 : vector<1x2x8xf32> to vector<2x8xf32>
    %c3 = arith.constant 3 : index
    %c0_6 = arith.constant 0 : index
    %c0_7 = arith.constant 0 : index
    %6 = vector.load %arg1[%c3, %c0_6, %c0_7] : memref<8x2x8xf32, #tpu.memory_space<vmem>>, vector<1x2x8xf32>
    %7 = vector.shape_cast %6 : vector<1x2x8xf32> to vector<2x8xf32>
    %c4 = arith.constant 4 : index
    %c0_8 = arith.constant 0 : index
    %c0_9 = arith.constant 0 : index
    %8 = vector.load %arg1[%c4, %c0_8, %c0_9] : memref<8x2x8xf32, #tpu.memory_space<vmem>>, vector<1x2x8xf32>
    %9 = vector.shape_cast %8 : vector<1x2x8xf32> to vector<2x8xf32>
    %c5 = arith.constant 5 : index
    %c0_10 = arith.constant 0 : index
    %c0_11 = arith.constant 0 : index
    %10 = vector.load %arg1[%c5, %c0_10, %c0_11] : memref<8x2x8xf32, #tpu.memory_space<vmem>>, vector<1x2x8xf32>
    %11 = vector.shape_cast %10 : vector<1x2x8xf32> to vector<2x8xf32>
    %c6 = arith.constant 6 : index
    %c0_12 = arith.constant 0 : index
    %c0_13 = arith.constant 0 : index
    %12 = vector.load %arg1[%c6, %c0_12, %c0_13] : memref<8x2x8xf32, #tpu.memory_space<vmem>>, vector<1x2x8xf32>
    %13 = vector.shape_cast %12 : vector<1x2x8xf32> to vector<2x8xf32>
    %c7 = arith.constant 7 : index
    %c0_14 = arith.constant 0 : index
    %c0_15 = arith.constant 0 : index
    %14 = vector.load %arg1[%c7, %c0_14, %c0_15] : memref<8x2x8xf32, #tpu.memory_space<vmem>>, vector<1x2x8xf32>
    %15 = vector.shape_cast %14 : vector<1x2x8xf32> to vector<2x8xf32>
    %c0_16 = arith.constant 0 : index
    %c0_17 = arith.constant 0 : index
    %16 = vector.load %arg3[%c0_16, %c0_17] : memref<8x96xbf16, #tpu.memory_space<vmem>>, vector<8x96xbf16>
    %c0_18 = arith.constant 0 : index
    %c0_19 = arith.constant 0 : index
    %17 = vector.load %arg4[%c0_18, %c0_19] : memref<32x96xbf16, #tpu.memory_space<vmem>>, vector<32x96xbf16>
    %c0_20 = arith.constant 0 : index
    %c0_21 = arith.constant 0 : index
    %18 = vector.load %arg5[%c0_20, %c0_21] : memref<1x96xf32, #tpu.memory_space<vmem>>, vector<1x96xf32>
    %19 = vector.shape_cast %18 : vector<1x96xf32> to vector<1x96xf32>
    %20 = vector.broadcast %19 : vector<1x96xf32> to vector<2x96xf32>
    %c0_22 = arith.constant 0 : index
    %c0_23 = arith.constant 0 : index
    %21 = vector.load %arg6[%c0_22, %c0_23] : memref<1x96xf32, #tpu.memory_space<vmem>>, vector<1x96xf32>
    %22 = vector.shape_cast %21 : vector<1x96xf32> to vector<1x96xf32>
    %23 = vector.broadcast %22 : vector<1x96xf32> to vector<2x96xf32>
    %24 = arith.truncf %1 : vector<2x8xf32> to vector<2x8xbf16>
    %cst = arith.constant dense<0.000000e+00> : vector<2x96xf32>
    %25 = tpu.matmul %24, %16, %cst {dimension_numbers = #tpu.dot_dimension_numbers<[1], [0], [0], [1], [0, 0, 1, 1], [], []>} : vector<2x8xbf16>, vector<8x96xbf16>, vector<2x96xf32> -> vector<2x96xf32>
    %26 = arith.addf %25, %20 : vector<2x96xf32>
    %27 = arith.truncf %3 : vector<2x8xf32> to vector<2x8xbf16>
    %cst_24 = arith.constant dense<0.000000e+00> : vector<2x96xf32>
    %28 = tpu.matmul %27, %16, %cst_24 {dimension_numbers = #tpu.dot_dimension_numbers<[1], [0], [0], [1], [0, 0, 1, 1], [], []>} : vector<2x8xbf16>, vector<8x96xbf16>, vector<2x96xf32> -> vector<2x96xf32>
    %29 = arith.addf %28, %20 : vector<2x96xf32>
    %30 = arith.truncf %5 : vector<2x8xf32> to vector<2x8xbf16>
    %cst_25 = arith.constant dense<0.000000e+00> : vector<2x96xf32>
    %31 = tpu.matmul %30, %16, %cst_25 {dimension_numbers = #tpu.dot_dimension_numbers<[1], [0], [0], [1], [0, 0, 1, 1], [], []>} : vector<2x8xbf16>, vector<8x96xbf16>, vector<2x96xf32> -> vector<2x96xf32>
    %32 = arith.addf %31, %20 : vector<2x96xf32>
    %33 = arith.truncf %7 : vector<2x8xf32> to vector<2x8xbf16>
    %cst_26 = arith.constant dense<0.000000e+00> : vector<2x96xf32>
    %34 = tpu.matmul %33, %16, %cst_26 {dimension_numbers = #tpu.dot_dimension_numbers<[1], [0], [0], [1], [0, 0, 1, 1], [], []>} : vector<2x8xbf16>, vector<8x96xbf16>, vector<2x96xf32> -> vector<2x96xf32>
    %35 = arith.addf %34, %20 : vector<2x96xf32>
    %36 = arith.truncf %9 : vector<2x8xf32> to vector<2x8xbf16>
    %cst_27 = arith.constant dense<0.000000e+00> : vector<2x96xf32>
    %37 = tpu.matmul %36, %16, %cst_27 {dimension_numbers = #tpu.dot_dimension_numbers<[1], [0], [0], [1], [0, 0, 1, 1], [], []>} : vector<2x8xbf16>, vector<8x96xbf16>, vector<2x96xf32> -> vector<2x96xf32>
    %38 = arith.addf %37, %20 : vector<2x96xf32>
    %39 = arith.truncf %11 : vector<2x8xf32> to vector<2x8xbf16>
    %cst_28 = arith.constant dense<0.000000e+00> : vector<2x96xf32>
    %40 = tpu.matmul %39, %16, %cst_28 {dimension_numbers = #tpu.dot_dimension_numbers<[1], [0], [0], [1], [0, 0, 1, 1], [], []>} : vector<2x8xbf16>, vector<8x96xbf16>, vector<2x96xf32> -> vector<2x96xf32>
    %41 = arith.addf %40, %20 : vector<2x96xf32>
    %42 = arith.truncf %13 : vector<2x8xf32> to vector<2x8xbf16>
    %cst_29 = arith.constant dense<0.000000e+00> : vector<2x96xf32>
    %43 = tpu.matmul %42, %16, %cst_29 {dimension_numbers = #tpu.dot_dimension_numbers<[1], [0], [0], [1], [0, 0, 1, 1], [], []>} : vector<2x8xbf16>, vector<8x96xbf16>, vector<2x96xf32> -> vector<2x96xf32>
    %44 = arith.addf %43, %20 : vector<2x96xf32>
    %45 = arith.truncf %15 : vector<2x8xf32> to vector<2x8xbf16>
    %cst_30 = arith.constant dense<0.000000e+00> : vector<2x96xf32>
    %46 = tpu.matmul %45, %16, %cst_30 {dimension_numbers = #tpu.dot_dimension_numbers<[1], [0], [0], [1], [0, 0, 1, 1], [], []>} : vector<2x8xbf16>, vector<8x96xbf16>, vector<2x96xf32> -> vector<2x96xf32>
    %47 = arith.addf %46, %20 : vector<2x96xf32>
    %c0_31 = arith.constant 0 : index
    %c0_32 = arith.constant 0 : index
    %c0_33 = arith.constant 0 : index
    %48 = vector.load %arg2[%c0_31, %c0_32, %c0_33] : memref<2x2x32xf32, #tpu.memory_space<vmem>>, vector<1x2x32xf32>
    %49 = vector.shape_cast %48 : vector<1x2x32xf32> to vector<2x32xf32>
    %50 = arith.truncf %49 : vector<2x32xf32> to vector<2x32xbf16>
    %cst_34 = arith.constant dense<0.000000e+00> : vector<2x96xf32>
    %51 = tpu.matmul %50, %17, %cst_34 {dimension_numbers = #tpu.dot_dimension_numbers<[1], [0], [0], [1], [0, 0, 1, 1], [], []>} : vector<2x32xbf16>, vector<32x96xbf16>, vector<2x96xf32> -> vector<2x96xf32>
    %52 = arith.addf %51, %23 : vector<2x96xf32>
    %53 = vector.extract_strided_slice %26 {offsets = [0, 0], sizes = [2, 64], strides = [1, 1]} : vector<2x96xf32> to vector<2x64xf32>
    %54 = vector.extract_strided_slice %52 {offsets = [0, 0], sizes = [2, 64], strides = [1, 1]} : vector<2x96xf32> to vector<2x64xf32>
    %55 = arith.addf %53, %54 : vector<2x64xf32>
    %56 = arith.negf %55 : vector<2x64xf32>
    %57 = math.exp %56 : vector<2x64xf32>
    %cst_35 = arith.constant 1.000000e+00 : f32
    %58 = vector.broadcast %cst_35 : f32 to vector<2x64xf32>
    %59 = arith.addf %58, %57 : vector<2x64xf32>
    %60 = arith.divf %58, %59 : vector<2x64xf32>
    %61 = vector.extract_strided_slice %60 {offsets = [0, 0], sizes = [2, 32], strides = [1, 1]} : vector<2x64xf32> to vector<2x32xf32>
    %62 = vector.extract_strided_slice %60 {offsets = [0, 32], sizes = [2, 32], strides = [1, 1]} : vector<2x64xf32> to vector<2x32xf32>
    %63 = vector.extract_strided_slice %26 {offsets = [0, 64], sizes = [2, 32], strides = [1, 1]} : vector<2x96xf32> to vector<2x32xf32>
    %64 = vector.extract_strided_slice %52 {offsets = [0, 64], sizes = [2, 32], strides = [1, 1]} : vector<2x96xf32> to vector<2x32xf32>
    %65 = arith.mulf %61, %64 : vector<2x32xf32>
    %66 = arith.addf %63, %65 : vector<2x32xf32>
    %67 = math.tanh %66 : vector<2x32xf32>
    %68 = arith.subf %49, %67 : vector<2x32xf32>
    %69 = arith.mulf %62, %68 : vector<2x32xf32>
    %70 = arith.addf %67, %69 : vector<2x32xf32>
    %71 = arith.truncf %70 : vector<2x32xf32> to vector<2x32xbf16>
    %cst_36 = arith.constant dense<0.000000e+00> : vector<2x96xf32>
    %72 = tpu.matmul %71, %17, %cst_36 {dimension_numbers = #tpu.dot_dimension_numbers<[1], [0], [0], [1], [0, 0, 1, 1], [], []>} : vector<2x32xbf16>, vector<32x96xbf16>, vector<2x96xf32> -> vector<2x96xf32>
    %73 = arith.addf %72, %23 : vector<2x96xf32>
    %74 = vector.extract_strided_slice %29 {offsets = [0, 0], sizes = [2, 64], strides = [1, 1]} : vector<2x96xf32> to vector<2x64xf32>
    %75 = vector.extract_strided_slice %73 {offsets = [0, 0], sizes = [2, 64], strides = [1, 1]} : vector<2x96xf32> to vector<2x64xf32>
    %76 = arith.addf %74, %75 : vector<2x64xf32>
    %77 = arith.negf %76 : vector<2x64xf32>
    %78 = math.exp %77 : vector<2x64xf32>
    %cst_37 = arith.constant 1.000000e+00 : f32
    %79 = vector.broadcast %cst_37 : f32 to vector<2x64xf32>
    %80 = arith.addf %79, %78 : vector<2x64xf32>
    %81 = arith.divf %79, %80 : vector<2x64xf32>
    %82 = vector.extract_strided_slice %81 {offsets = [0, 0], sizes = [2, 32], strides = [1, 1]} : vector<2x64xf32> to vector<2x32xf32>
    %83 = vector.extract_strided_slice %81 {offsets = [0, 32], sizes = [2, 32], strides = [1, 1]} : vector<2x64xf32> to vector<2x32xf32>
    %84 = vector.extract_strided_slice %29 {offsets = [0, 64], sizes = [2, 32], strides = [1, 1]} : vector<2x96xf32> to vector<2x32xf32>
    %85 = vector.extract_strided_slice %73 {offsets = [0, 64], sizes = [2, 32], strides = [1, 1]} : vector<2x96xf32> to vector<2x32xf32>
    %86 = arith.mulf %82, %85 : vector<2x32xf32>
    %87 = arith.addf %84, %86 : vector<2x32xf32>
    %88 = math.tanh %87 : vector<2x32xf32>
    %89 = arith.subf %70, %88 : vector<2x32xf32>
    %90 = arith.mulf %83, %89 : vector<2x32xf32>
    %91 = arith.addf %88, %90 : vector<2x32xf32>
    %92 = arith.truncf %91 : vector<2x32xf32> to vector<2x32xbf16>
    %cst_38 = arith.constant dense<0.000000e+00> : vector<2x96xf32>
    %93 = tpu.matmul %92, %17, %cst_38 {dimension_numbers = #tpu.dot_dimension_numbers<[1], [0], [0], [1], [0, 0, 1, 1], [], []>} : vector<2x32xbf16>, vector<32x96xbf16>, vector<2x96xf32> -> vector<2x96xf32>
    %94 = arith.addf %93, %23 : vector<2x96xf32>
    %95 = vector.extract_strided_slice %32 {offsets = [0, 0], sizes = [2, 64], strides = [1, 1]} : vector<2x96xf32> to vector<2x64xf32>
    %96 = vector.extract_strided_slice %94 {offsets = [0, 0], sizes = [2, 64], strides = [1, 1]} : vector<2x96xf32> to vector<2x64xf32>
    %97 = arith.addf %95, %96 : vector<2x64xf32>
    %98 = arith.negf %97 : vector<2x64xf32>
    %99 = math.exp %98 : vector<2x64xf32>
    %cst_39 = arith.constant 1.000000e+00 : f32
    %100 = vector.broadcast %cst_39 : f32 to vector<2x64xf32>
    %101 = arith.addf %100, %99 : vector<2x64xf32>
    %102 = arith.divf %100, %101 : vector<2x64xf32>
    %103 = vector.extract_strided_slice %102 {offsets = [0, 0], sizes = [2, 32], strides = [1, 1]} : vector<2x64xf32> to vector<2x32xf32>
    %104 = vector.extract_strided_slice %102 {offsets = [0, 32], sizes = [2, 32], strides = [1, 1]} : vector<2x64xf32> to vector<2x32xf32>
    %105 = vector.extract_strided_slice %32 {offsets = [0, 64], sizes = [2, 32], strides = [1, 1]} : vector<2x96xf32> to vector<2x32xf32>
    %106 = vector.extract_strided_slice %94 {offsets = [0, 64], sizes = [2, 32], strides = [1, 1]} : vector<2x96xf32> to vector<2x32xf32>
    %107 = arith.mulf %103, %106 : vector<2x32xf32>
    %108 = arith.addf %105, %107 : vector<2x32xf32>
    %109 = math.tanh %108 : vector<2x32xf32>
    %110 = arith.subf %91, %109 : vector<2x32xf32>
    %111 = arith.mulf %104, %110 : vector<2x32xf32>
    %112 = arith.addf %109, %111 : vector<2x32xf32>
    %113 = arith.truncf %112 : vector<2x32xf32> to vector<2x32xbf16>
    %cst_40 = arith.constant dense<0.000000e+00> : vector<2x96xf32>
    %114 = tpu.matmul %113, %17, %cst_40 {dimension_numbers = #tpu.dot_dimension_numbers<[1], [0], [0], [1], [0, 0, 1, 1], [], []>} : vector<2x32xbf16>, vector<32x96xbf16>, vector<2x96xf32> -> vector<2x96xf32>
    %115 = arith.addf %114, %23 : vector<2x96xf32>
    %116 = vector.extract_strided_slice %35 {offsets = [0, 0], sizes = [2, 64], strides = [1, 1]} : vector<2x96xf32> to vector<2x64xf32>
    %117 = vector.extract_strided_slice %115 {offsets = [0, 0], sizes = [2, 64], strides = [1, 1]} : vector<2x96xf32> to vector<2x64xf32>
    %118 = arith.addf %116, %117 : vector<2x64xf32>
    %119 = arith.negf %118 : vector<2x64xf32>
    %120 = math.exp %119 : vector<2x64xf32>
    %cst_41 = arith.constant 1.000000e+00 : f32
    %121 = vector.broadcast %cst_41 : f32 to vector<2x64xf32>
    %122 = arith.addf %121, %120 : vector<2x64xf32>
    %123 = arith.divf %121, %122 : vector<2x64xf32>
    %124 = vector.extract_strided_slice %123 {offsets = [0, 0], sizes = [2, 32], strides = [1, 1]} : vector<2x64xf32> to vector<2x32xf32>
    %125 = vector.extract_strided_slice %123 {offsets = [0, 32], sizes = [2, 32], strides = [1, 1]} : vector<2x64xf32> to vector<2x32xf32>
    %126 = vector.extract_strided_slice %35 {offsets = [0, 64], sizes = [2, 32], strides = [1, 1]} : vector<2x96xf32> to vector<2x32xf32>
    %127 = vector.extract_strided_slice %115 {offsets = [0, 64], sizes = [2, 32], strides = [1, 1]} : vector<2x96xf32> to vector<2x32xf32>
    %128 = arith.mulf %124, %127 : vector<2x32xf32>
    %129 = arith.addf %126, %128 : vector<2x32xf32>
    %130 = math.tanh %129 : vector<2x32xf32>
    %131 = arith.subf %112, %130 : vector<2x32xf32>
    %132 = arith.mulf %125, %131 : vector<2x32xf32>
    %133 = arith.addf %130, %132 : vector<2x32xf32>
    %134 = arith.truncf %133 : vector<2x32xf32> to vector<2x32xbf16>
    %cst_42 = arith.constant dense<0.000000e+00> : vector<2x96xf32>
    %135 = tpu.matmul %134, %17, %cst_42 {dimension_numbers = #tpu.dot_dimension_numbers<[1], [0], [0], [1], [0, 0, 1, 1], [], []>} : vector<2x32xbf16>, vector<32x96xbf16>, vector<2x96xf32> -> vector<2x96xf32>
    %136 = arith.addf %135, %23 : vector<2x96xf32>
    %137 = vector.extract_strided_slice %38 {offsets = [0, 0], sizes = [2, 64], strides = [1, 1]} : vector<2x96xf32> to vector<2x64xf32>
    %138 = vector.extract_strided_slice %136 {offsets = [0, 0], sizes = [2, 64], strides = [1, 1]} : vector<2x96xf32> to vector<2x64xf32>
    %139 = arith.addf %137, %138 : vector<2x64xf32>
    %140 = arith.negf %139 : vector<2x64xf32>
    %141 = math.exp %140 : vector<2x64xf32>
    %cst_43 = arith.constant 1.000000e+00 : f32
    %142 = vector.broadcast %cst_43 : f32 to vector<2x64xf32>
    %143 = arith.addf %142, %141 : vector<2x64xf32>
    %144 = arith.divf %142, %143 : vector<2x64xf32>
    %145 = vector.extract_strided_slice %144 {offsets = [0, 0], sizes = [2, 32], strides = [1, 1]} : vector<2x64xf32> to vector<2x32xf32>
    %146 = vector.extract_strided_slice %144 {offsets = [0, 32], sizes = [2, 32], strides = [1, 1]} : vector<2x64xf32> to vector<2x32xf32>
    %147 = vector.extract_strided_slice %38 {offsets = [0, 64], sizes = [2, 32], strides = [1, 1]} : vector<2x96xf32> to vector<2x32xf32>
    %148 = vector.extract_strided_slice %136 {offsets = [0, 64], sizes = [2, 32], strides = [1, 1]} : vector<2x96xf32> to vector<2x32xf32>
    %149 = arith.mulf %145, %148 : vector<2x32xf32>
    %150 = arith.addf %147, %149 : vector<2x32xf32>
    %151 = math.tanh %150 : vector<2x32xf32>
    %152 = arith.subf %133, %151 : vector<2x32xf32>
    %153 = arith.mulf %146, %152 : vector<2x32xf32>
    %154 = arith.addf %151, %153 : vector<2x32xf32>
    %155 = arith.truncf %154 : vector<2x32xf32> to vector<2x32xbf16>
    %cst_44 = arith.constant dense<0.000000e+00> : vector<2x96xf32>
    %156 = tpu.matmul %155, %17, %cst_44 {dimension_numbers = #tpu.dot_dimension_numbers<[1], [0], [0], [1], [0, 0, 1, 1], [], []>} : vector<2x32xbf16>, vector<32x96xbf16>, vector<2x96xf32> -> vector<2x96xf32>
    %157 = arith.addf %156, %23 : vector<2x96xf32>
    %158 = vector.extract_strided_slice %41 {offsets = [0, 0], sizes = [2, 64], strides = [1, 1]} : vector<2x96xf32> to vector<2x64xf32>
    %159 = vector.extract_strided_slice %157 {offsets = [0, 0], sizes = [2, 64], strides = [1, 1]} : vector<2x96xf32> to vector<2x64xf32>
    %160 = arith.addf %158, %159 : vector<2x64xf32>
    %161 = arith.negf %160 : vector<2x64xf32>
    %162 = math.exp %161 : vector<2x64xf32>
    %cst_45 = arith.constant 1.000000e+00 : f32
    %163 = vector.broadcast %cst_45 : f32 to vector<2x64xf32>
    %164 = arith.addf %163, %162 : vector<2x64xf32>
    %165 = arith.divf %163, %164 : vector<2x64xf32>
    %166 = vector.extract_strided_slice %165 {offsets = [0, 0], sizes = [2, 32], strides = [1, 1]} : vector<2x64xf32> to vector<2x32xf32>
    %167 = vector.extract_strided_slice %165 {offsets = [0, 32], sizes = [2, 32], strides = [1, 1]} : vector<2x64xf32> to vector<2x32xf32>
    %168 = vector.extract_strided_slice %41 {offsets = [0, 64], sizes = [2, 32], strides = [1, 1]} : vector<2x96xf32> to vector<2x32xf32>
    %169 = vector.extract_strided_slice %157 {offsets = [0, 64], sizes = [2, 32], strides = [1, 1]} : vector<2x96xf32> to vector<2x32xf32>
    %170 = arith.mulf %166, %169 : vector<2x32xf32>
    %171 = arith.addf %168, %170 : vector<2x32xf32>
    %172 = math.tanh %171 : vector<2x32xf32>
    %173 = arith.subf %154, %172 : vector<2x32xf32>
    %174 = arith.mulf %167, %173 : vector<2x32xf32>
    %175 = arith.addf %172, %174 : vector<2x32xf32>
    %176 = arith.truncf %175 : vector<2x32xf32> to vector<2x32xbf16>
    %cst_46 = arith.constant dense<0.000000e+00> : vector<2x96xf32>
    %177 = tpu.matmul %176, %17, %cst_46 {dimension_numbers = #tpu.dot_dimension_numbers<[1], [0], [0], [1], [0, 0, 1, 1], [], []>} : vector<2x32xbf16>, vector<32x96xbf16>, vector<2x96xf32> -> vector<2x96xf32>
    %178 = arith.addf %177, %23 : vector<2x96xf32>
    %179 = vector.extract_strided_slice %44 {offsets = [0, 0], sizes = [2, 64], strides = [1, 1]} : vector<2x96xf32> to vector<2x64xf32>
    %180 = vector.extract_strided_slice %178 {offsets = [0, 0], sizes = [2, 64], strides = [1, 1]} : vector<2x96xf32> to vector<2x64xf32>
    %181 = arith.addf %179, %180 : vector<2x64xf32>
    %182 = arith.negf %181 : vector<2x64xf32>
    %183 = math.exp %182 : vector<2x64xf32>
    %cst_47 = arith.constant 1.000000e+00 : f32
    %184 = vector.broadcast %cst_47 : f32 to vector<2x64xf32>
    %185 = arith.addf %184, %183 : vector<2x64xf32>
    %186 = arith.divf %184, %185 : vector<2x64xf32>
    %187 = vector.extract_strided_slice %186 {offsets = [0, 0], sizes = [2, 32], strides = [1, 1]} : vector<2x64xf32> to vector<2x32xf32>
    %188 = vector.extract_strided_slice %186 {offsets = [0, 32], sizes = [2, 32], strides = [1, 1]} : vector<2x64xf32> to vector<2x32xf32>
    %189 = vector.extract_strided_slice %44 {offsets = [0, 64], sizes = [2, 32], strides = [1, 1]} : vector<2x96xf32> to vector<2x32xf32>
    %190 = vector.extract_strided_slice %178 {offsets = [0, 64], sizes = [2, 32], strides = [1, 1]} : vector<2x96xf32> to vector<2x32xf32>
    %191 = arith.mulf %187, %190 : vector<2x32xf32>
    %192 = arith.addf %189, %191 : vector<2x32xf32>
    %193 = math.tanh %192 : vector<2x32xf32>
    %194 = arith.subf %175, %193 : vector<2x32xf32>
    %195 = arith.mulf %188, %194 : vector<2x32xf32>
    %196 = arith.addf %193, %195 : vector<2x32xf32>
    %197 = arith.truncf %196 : vector<2x32xf32> to vector<2x32xbf16>
    %cst_48 = arith.constant dense<0.000000e+00> : vector<2x96xf32>
    %198 = tpu.matmul %197, %17, %cst_48 {dimension_numbers = #tpu.dot_dimension_numbers<[1], [0], [0], [1], [0, 0, 1, 1], [], []>} : vector<2x32xbf16>, vector<32x96xbf16>, vector<2x96xf32> -> vector<2x96xf32>
    %199 = arith.addf %198, %23 : vector<2x96xf32>
    %200 = vector.extract_strided_slice %47 {offsets = [0, 0], sizes = [2, 64], strides = [1, 1]} : vector<2x96xf32> to vector<2x64xf32>
    %201 = vector.extract_strided_slice %199 {offsets = [0, 0], sizes = [2, 64], strides = [1, 1]} : vector<2x96xf32> to vector<2x64xf32>
    %202 = arith.addf %200, %201 : vector<2x64xf32>
    %203 = arith.negf %202 : vector<2x64xf32>
    %204 = math.exp %203 : vector<2x64xf32>
    %cst_49 = arith.constant 1.000000e+00 : f32
    %205 = vector.broadcast %cst_49 : f32 to vector<2x64xf32>
    %206 = arith.addf %205, %204 : vector<2x64xf32>
    %207 = arith.divf %205, %206 : vector<2x64xf32>
    %208 = vector.extract_strided_slice %207 {offsets = [0, 0], sizes = [2, 32], strides = [1, 1]} : vector<2x64xf32> to vector<2x32xf32>
    %209 = vector.extract_strided_slice %207 {offsets = [0, 32], sizes = [2, 32], strides = [1, 1]} : vector<2x64xf32> to vector<2x32xf32>
    %210 = vector.extract_strided_slice %47 {offsets = [0, 64], sizes = [2, 32], strides = [1, 1]} : vector<2x96xf32> to vector<2x32xf32>
    %211 = vector.extract_strided_slice %199 {offsets = [0, 64], sizes = [2, 32], strides = [1, 1]} : vector<2x96xf32> to vector<2x32xf32>
    %212 = arith.mulf %208, %211 : vector<2x32xf32>
    %213 = arith.addf %210, %212 : vector<2x32xf32>
    %214 = math.tanh %213 : vector<2x32xf32>
    %215 = arith.subf %196, %214 : vector<2x32xf32>
    %216 = arith.mulf %209, %215 : vector<2x32xf32>
    %217 = arith.addf %214, %216 : vector<2x32xf32>
    %c0_50 = arith.constant 0 : index
    %c0_51 = arith.constant 0 : index
    %218 = vector.load %arg7[%c0_50, %c0_51] : memref<32x96xbf16, #tpu.memory_space<vmem>>, vector<32x96xbf16>
    %c0_52 = arith.constant 0 : index
    %c0_53 = arith.constant 0 : index
    %219 = vector.load %arg8[%c0_52, %c0_53] : memref<32x96xbf16, #tpu.memory_space<vmem>>, vector<32x96xbf16>
    %c0_54 = arith.constant 0 : index
    %c0_55 = arith.constant 0 : index
    %220 = vector.load %arg9[%c0_54, %c0_55] : memref<1x96xf32, #tpu.memory_space<vmem>>, vector<1x96xf32>
    %221 = vector.shape_cast %220 : vector<1x96xf32> to vector<1x96xf32>
    %222 = vector.broadcast %221 : vector<1x96xf32> to vector<2x96xf32>
    %c0_56 = arith.constant 0 : index
    %c0_57 = arith.constant 0 : index
    %223 = vector.load %arg10[%c0_56, %c0_57] : memref<1x96xf32, #tpu.memory_space<vmem>>, vector<1x96xf32>
    %224 = vector.shape_cast %223 : vector<1x96xf32> to vector<1x96xf32>
    %225 = vector.broadcast %224 : vector<1x96xf32> to vector<2x96xf32>
    %226 = arith.truncf %70 : vector<2x32xf32> to vector<2x32xbf16>
    %cst_58 = arith.constant dense<0.000000e+00> : vector<2x96xf32>
    %227 = tpu.matmul %226, %218, %cst_58 {dimension_numbers = #tpu.dot_dimension_numbers<[1], [0], [0], [1], [0, 0, 1, 1], [], []>} : vector<2x32xbf16>, vector<32x96xbf16>, vector<2x96xf32> -> vector<2x96xf32>
    %228 = arith.addf %227, %222 : vector<2x96xf32>
    %229 = arith.truncf %91 : vector<2x32xf32> to vector<2x32xbf16>
    %cst_59 = arith.constant dense<0.000000e+00> : vector<2x96xf32>
    %230 = tpu.matmul %229, %218, %cst_59 {dimension_numbers = #tpu.dot_dimension_numbers<[1], [0], [0], [1], [0, 0, 1, 1], [], []>} : vector<2x32xbf16>, vector<32x96xbf16>, vector<2x96xf32> -> vector<2x96xf32>
    %231 = arith.addf %230, %222 : vector<2x96xf32>
    %232 = arith.truncf %112 : vector<2x32xf32> to vector<2x32xbf16>
    %cst_60 = arith.constant dense<0.000000e+00> : vector<2x96xf32>
    %233 = tpu.matmul %232, %218, %cst_60 {dimension_numbers = #tpu.dot_dimension_numbers<[1], [0], [0], [1], [0, 0, 1, 1], [], []>} : vector<2x32xbf16>, vector<32x96xbf16>, vector<2x96xf32> -> vector<2x96xf32>
    %234 = arith.addf %233, %222 : vector<2x96xf32>
    %235 = arith.truncf %133 : vector<2x32xf32> to vector<2x32xbf16>
    %cst_61 = arith.constant dense<0.000000e+00> : vector<2x96xf32>
    %236 = tpu.matmul %235, %218, %cst_61 {dimension_numbers = #tpu.dot_dimension_numbers<[1], [0], [0], [1], [0, 0, 1, 1], [], []>} : vector<2x32xbf16>, vector<32x96xbf16>, vector<2x96xf32> -> vector<2x96xf32>
    %237 = arith.addf %236, %222 : vector<2x96xf32>
    %238 = arith.truncf %154 : vector<2x32xf32> to vector<2x32xbf16>
    %cst_62 = arith.constant dense<0.000000e+00> : vector<2x96xf32>
    %239 = tpu.matmul %238, %218, %cst_62 {dimension_numbers = #tpu.dot_dimension_numbers<[1], [0], [0], [1], [0, 0, 1, 1], [], []>} : vector<2x32xbf16>, vector<32x96xbf16>, vector<2x96xf32> -> vector<2x96xf32>
    %240 = arith.addf %239, %222 : vector<2x96xf32>
    %241 = arith.truncf %175 : vector<2x32xf32> to vector<2x32xbf16>
    %cst_63 = arith.constant dense<0.000000e+00> : vector<2x96xf32>
    %242 = tpu.matmul %241, %218, %cst_63 {dimension_numbers = #tpu.dot_dimension_numbers<[1], [0], [0], [1], [0, 0, 1, 1], [], []>} : vector<2x32xbf16>, vector<32x96xbf16>, vector<2x96xf32> -> vector<2x96xf32>
    %243 = arith.addf %242, %222 : vector<2x96xf32>
    %244 = arith.truncf %196 : vector<2x32xf32> to vector<2x32xbf16>
    %cst_64 = arith.constant dense<0.000000e+00> : vector<2x96xf32>
    %245 = tpu.matmul %244, %218, %cst_64 {dimension_numbers = #tpu.dot_dimension_numbers<[1], [0], [0], [1], [0, 0, 1, 1], [], []>} : vector<2x32xbf16>, vector<32x96xbf16>, vector<2x96xf32> -> vector<2x96xf32>
    %246 = arith.addf %245, %222 : vector<2x96xf32>
    %247 = arith.truncf %217 : vector<2x32xf32> to vector<2x32xbf16>
    %cst_65 = arith.constant dense<0.000000e+00> : vector<2x96xf32>
    %248 = tpu.matmul %247, %218, %cst_65 {dimension_numbers = #tpu.dot_dimension_numbers<[1], [0], [0], [1], [0, 0, 1, 1], [], []>} : vector<2x32xbf16>, vector<32x96xbf16>, vector<2x96xf32> -> vector<2x96xf32>
    %249 = arith.addf %248, %222 : vector<2x96xf32>
    %c1_66 = arith.constant 1 : index
    %c0_67 = arith.constant 0 : index
    %c0_68 = arith.constant 0 : index
    %250 = vector.load %arg2[%c1_66, %c0_67, %c0_68] : memref<2x2x32xf32, #tpu.memory_space<vmem>>, vector<1x2x32xf32>
    %251 = vector.shape_cast %250 : vector<1x2x32xf32> to vector<2x32xf32>
    %252 = arith.truncf %251 : vector<2x32xf32> to vector<2x32xbf16>
    %cst_69 = arith.constant dense<0.000000e+00> : vector<2x96xf32>
    %253 = tpu.matmul %252, %219, %cst_69 {dimension_numbers = #tpu.dot_dimension_numbers<[1], [0], [0], [1], [0, 0, 1, 1], [], []>} : vector<2x32xbf16>, vector<32x96xbf16>, vector<2x96xf32> -> vector<2x96xf32>
    %254 = arith.addf %253, %225 : vector<2x96xf32>
    %255 = vector.extract_strided_slice %228 {offsets = [0, 0], sizes = [2, 64], strides = [1, 1]} : vector<2x96xf32> to vector<2x64xf32>
    %256 = vector.extract_strided_slice %254 {offsets = [0, 0], sizes = [2, 64], strides = [1, 1]} : vector<2x96xf32> to vector<2x64xf32>
    %257 = arith.addf %255, %256 : vector<2x64xf32>
    %258 = arith.negf %257 : vector<2x64xf32>
    %259 = math.exp %258 : vector<2x64xf32>
    %cst_70 = arith.constant 1.000000e+00 : f32
    %260 = vector.broadcast %cst_70 : f32 to vector<2x64xf32>
    %261 = arith.addf %260, %259 : vector<2x64xf32>
    %262 = arith.divf %260, %261 : vector<2x64xf32>
    %263 = vector.extract_strided_slice %262 {offsets = [0, 0], sizes = [2, 32], strides = [1, 1]} : vector<2x64xf32> to vector<2x32xf32>
    %264 = vector.extract_strided_slice %262 {offsets = [0, 32], sizes = [2, 32], strides = [1, 1]} : vector<2x64xf32> to vector<2x32xf32>
    %265 = vector.extract_strided_slice %228 {offsets = [0, 64], sizes = [2, 32], strides = [1, 1]} : vector<2x96xf32> to vector<2x32xf32>
    %266 = vector.extract_strided_slice %254 {offsets = [0, 64], sizes = [2, 32], strides = [1, 1]} : vector<2x96xf32> to vector<2x32xf32>
    %267 = arith.mulf %263, %266 : vector<2x32xf32>
    %268 = arith.addf %265, %267 : vector<2x32xf32>
    %269 = math.tanh %268 : vector<2x32xf32>
    %270 = arith.subf %251, %269 : vector<2x32xf32>
    %271 = arith.mulf %264, %270 : vector<2x32xf32>
    %272 = arith.addf %269, %271 : vector<2x32xf32>
    %273 = arith.truncf %272 : vector<2x32xf32> to vector<2x32xbf16>
    %cst_71 = arith.constant dense<0.000000e+00> : vector<2x96xf32>
    %274 = tpu.matmul %273, %219, %cst_71 {dimension_numbers = #tpu.dot_dimension_numbers<[1], [0], [0], [1], [0, 0, 1, 1], [], []>} : vector<2x32xbf16>, vector<32x96xbf16>, vector<2x96xf32> -> vector<2x96xf32>
    %275 = arith.addf %274, %225 : vector<2x96xf32>
    %276 = vector.extract_strided_slice %231 {offsets = [0, 0], sizes = [2, 64], strides = [1, 1]} : vector<2x96xf32> to vector<2x64xf32>
    %277 = vector.extract_strided_slice %275 {offsets = [0, 0], sizes = [2, 64], strides = [1, 1]} : vector<2x96xf32> to vector<2x64xf32>
    %278 = arith.addf %276, %277 : vector<2x64xf32>
    %279 = arith.negf %278 : vector<2x64xf32>
    %280 = math.exp %279 : vector<2x64xf32>
    %cst_72 = arith.constant 1.000000e+00 : f32
    %281 = vector.broadcast %cst_72 : f32 to vector<2x64xf32>
    %282 = arith.addf %281, %280 : vector<2x64xf32>
    %283 = arith.divf %281, %282 : vector<2x64xf32>
    %284 = vector.extract_strided_slice %283 {offsets = [0, 0], sizes = [2, 32], strides = [1, 1]} : vector<2x64xf32> to vector<2x32xf32>
    %285 = vector.extract_strided_slice %283 {offsets = [0, 32], sizes = [2, 32], strides = [1, 1]} : vector<2x64xf32> to vector<2x32xf32>
    %286 = vector.extract_strided_slice %231 {offsets = [0, 64], sizes = [2, 32], strides = [1, 1]} : vector<2x96xf32> to vector<2x32xf32>
    %287 = vector.extract_strided_slice %275 {offsets = [0, 64], sizes = [2, 32], strides = [1, 1]} : vector<2x96xf32> to vector<2x32xf32>
    %288 = arith.mulf %284, %287 : vector<2x32xf32>
    %289 = arith.addf %286, %288 : vector<2x32xf32>
    %290 = math.tanh %289 : vector<2x32xf32>
    %291 = arith.subf %272, %290 : vector<2x32xf32>
    %292 = arith.mulf %285, %291 : vector<2x32xf32>
    %293 = arith.addf %290, %292 : vector<2x32xf32>
    %294 = arith.truncf %293 : vector<2x32xf32> to vector<2x32xbf16>
    %cst_73 = arith.constant dense<0.000000e+00> : vector<2x96xf32>
    %295 = tpu.matmul %294, %219, %cst_73 {dimension_numbers = #tpu.dot_dimension_numbers<[1], [0], [0], [1], [0, 0, 1, 1], [], []>} : vector<2x32xbf16>, vector<32x96xbf16>, vector<2x96xf32> -> vector<2x96xf32>
    %296 = arith.addf %295, %225 : vector<2x96xf32>
    %297 = vector.extract_strided_slice %234 {offsets = [0, 0], sizes = [2, 64], strides = [1, 1]} : vector<2x96xf32> to vector<2x64xf32>
    %298 = vector.extract_strided_slice %296 {offsets = [0, 0], sizes = [2, 64], strides = [1, 1]} : vector<2x96xf32> to vector<2x64xf32>
    %299 = arith.addf %297, %298 : vector<2x64xf32>
    %300 = arith.negf %299 : vector<2x64xf32>
    %301 = math.exp %300 : vector<2x64xf32>
    %cst_74 = arith.constant 1.000000e+00 : f32
    %302 = vector.broadcast %cst_74 : f32 to vector<2x64xf32>
    %303 = arith.addf %302, %301 : vector<2x64xf32>
    %304 = arith.divf %302, %303 : vector<2x64xf32>
    %305 = vector.extract_strided_slice %304 {offsets = [0, 0], sizes = [2, 32], strides = [1, 1]} : vector<2x64xf32> to vector<2x32xf32>
    %306 = vector.extract_strided_slice %304 {offsets = [0, 32], sizes = [2, 32], strides = [1, 1]} : vector<2x64xf32> to vector<2x32xf32>
    %307 = vector.extract_strided_slice %234 {offsets = [0, 64], sizes = [2, 32], strides = [1, 1]} : vector<2x96xf32> to vector<2x32xf32>
    %308 = vector.extract_strided_slice %296 {offsets = [0, 64], sizes = [2, 32], strides = [1, 1]} : vector<2x96xf32> to vector<2x32xf32>
    %309 = arith.mulf %305, %308 : vector<2x32xf32>
    %310 = arith.addf %307, %309 : vector<2x32xf32>
    %311 = math.tanh %310 : vector<2x32xf32>
    %312 = arith.subf %293, %311 : vector<2x32xf32>
    %313 = arith.mulf %306, %312 : vector<2x32xf32>
    %314 = arith.addf %311, %313 : vector<2x32xf32>
    %315 = arith.truncf %314 : vector<2x32xf32> to vector<2x32xbf16>
    %cst_75 = arith.constant dense<0.000000e+00> : vector<2x96xf32>
    %316 = tpu.matmul %315, %219, %cst_75 {dimension_numbers = #tpu.dot_dimension_numbers<[1], [0], [0], [1], [0, 0, 1, 1], [], []>} : vector<2x32xbf16>, vector<32x96xbf16>, vector<2x96xf32> -> vector<2x96xf32>
    %317 = arith.addf %316, %225 : vector<2x96xf32>
    %318 = vector.extract_strided_slice %237 {offsets = [0, 0], sizes = [2, 64], strides = [1, 1]} : vector<2x96xf32> to vector<2x64xf32>
    %319 = vector.extract_strided_slice %317 {offsets = [0, 0], sizes = [2, 64], strides = [1, 1]} : vector<2x96xf32> to vector<2x64xf32>
    %320 = arith.addf %318, %319 : vector<2x64xf32>
    %321 = arith.negf %320 : vector<2x64xf32>
    %322 = math.exp %321 : vector<2x64xf32>
    %cst_76 = arith.constant 1.000000e+00 : f32
    %323 = vector.broadcast %cst_76 : f32 to vector<2x64xf32>
    %324 = arith.addf %323, %322 : vector<2x64xf32>
    %325 = arith.divf %323, %324 : vector<2x64xf32>
    %326 = vector.extract_strided_slice %325 {offsets = [0, 0], sizes = [2, 32], strides = [1, 1]} : vector<2x64xf32> to vector<2x32xf32>
    %327 = vector.extract_strided_slice %325 {offsets = [0, 32], sizes = [2, 32], strides = [1, 1]} : vector<2x64xf32> to vector<2x32xf32>
    %328 = vector.extract_strided_slice %237 {offsets = [0, 64], sizes = [2, 32], strides = [1, 1]} : vector<2x96xf32> to vector<2x32xf32>
    %329 = vector.extract_strided_slice %317 {offsets = [0, 64], sizes = [2, 32], strides = [1, 1]} : vector<2x96xf32> to vector<2x32xf32>
    %330 = arith.mulf %326, %329 : vector<2x32xf32>
    %331 = arith.addf %328, %330 : vector<2x32xf32>
    %332 = math.tanh %331 : vector<2x32xf32>
    %333 = arith.subf %314, %332 : vector<2x32xf32>
    %334 = arith.mulf %327, %333 : vector<2x32xf32>
    %335 = arith.addf %332, %334 : vector<2x32xf32>
    %336 = arith.truncf %335 : vector<2x32xf32> to vector<2x32xbf16>
    %cst_77 = arith.constant dense<0.000000e+00> : vector<2x96xf32>
    %337 = tpu.matmul %336, %219, %cst_77 {dimension_numbers = #tpu.dot_dimension_numbers<[1], [0], [0], [1], [0, 0, 1, 1], [], []>} : vector<2x32xbf16>, vector<32x96xbf16>, vector<2x96xf32> -> vector<2x96xf32>
    %338 = arith.addf %337, %225 : vector<2x96xf32>
    %339 = vector.extract_strided_slice %240 {offsets = [0, 0], sizes = [2, 64], strides = [1, 1]} : vector<2x96xf32> to vector<2x64xf32>
    %340 = vector.extract_strided_slice %338 {offsets = [0, 0], sizes = [2, 64], strides = [1, 1]} : vector<2x96xf32> to vector<2x64xf32>
    %341 = arith.addf %339, %340 : vector<2x64xf32>
    %342 = arith.negf %341 : vector<2x64xf32>
    %343 = math.exp %342 : vector<2x64xf32>
    %cst_78 = arith.constant 1.000000e+00 : f32
    %344 = vector.broadcast %cst_78 : f32 to vector<2x64xf32>
    %345 = arith.addf %344, %343 : vector<2x64xf32>
    %346 = arith.divf %344, %345 : vector<2x64xf32>
    %347 = vector.extract_strided_slice %346 {offsets = [0, 0], sizes = [2, 32], strides = [1, 1]} : vector<2x64xf32> to vector<2x32xf32>
    %348 = vector.extract_strided_slice %346 {offsets = [0, 32], sizes = [2, 32], strides = [1, 1]} : vector<2x64xf32> to vector<2x32xf32>
    %349 = vector.extract_strided_slice %240 {offsets = [0, 64], sizes = [2, 32], strides = [1, 1]} : vector<2x96xf32> to vector<2x32xf32>
    %350 = vector.extract_strided_slice %338 {offsets = [0, 64], sizes = [2, 32], strides = [1, 1]} : vector<2x96xf32> to vector<2x32xf32>
    %351 = arith.mulf %347, %350 : vector<2x32xf32>
    %352 = arith.addf %349, %351 : vector<2x32xf32>
    %353 = math.tanh %352 : vector<2x32xf32>
    %354 = arith.subf %335, %353 : vector<2x32xf32>
    %355 = arith.mulf %348, %354 : vector<2x32xf32>
    %356 = arith.addf %353, %355 : vector<2x32xf32>
    %357 = arith.truncf %356 : vector<2x32xf32> to vector<2x32xbf16>
    %cst_79 = arith.constant dense<0.000000e+00> : vector<2x96xf32>
    %358 = tpu.matmul %357, %219, %cst_79 {dimension_numbers = #tpu.dot_dimension_numbers<[1], [0], [0], [1], [0, 0, 1, 1], [], []>} : vector<2x32xbf16>, vector<32x96xbf16>, vector<2x96xf32> -> vector<2x96xf32>
    %359 = arith.addf %358, %225 : vector<2x96xf32>
    %360 = vector.extract_strided_slice %243 {offsets = [0, 0], sizes = [2, 64], strides = [1, 1]} : vector<2x96xf32> to vector<2x64xf32>
    %361 = vector.extract_strided_slice %359 {offsets = [0, 0], sizes = [2, 64], strides = [1, 1]} : vector<2x96xf32> to vector<2x64xf32>
    %362 = arith.addf %360, %361 : vector<2x64xf32>
    %363 = arith.negf %362 : vector<2x64xf32>
    %364 = math.exp %363 : vector<2x64xf32>
    %cst_80 = arith.constant 1.000000e+00 : f32
    %365 = vector.broadcast %cst_80 : f32 to vector<2x64xf32>
    %366 = arith.addf %365, %364 : vector<2x64xf32>
    %367 = arith.divf %365, %366 : vector<2x64xf32>
    %368 = vector.extract_strided_slice %367 {offsets = [0, 0], sizes = [2, 32], strides = [1, 1]} : vector<2x64xf32> to vector<2x32xf32>
    %369 = vector.extract_strided_slice %367 {offsets = [0, 32], sizes = [2, 32], strides = [1, 1]} : vector<2x64xf32> to vector<2x32xf32>
    %370 = vector.extract_strided_slice %243 {offsets = [0, 64], sizes = [2, 32], strides = [1, 1]} : vector<2x96xf32> to vector<2x32xf32>
    %371 = vector.extract_strided_slice %359 {offsets = [0, 64], sizes = [2, 32], strides = [1, 1]} : vector<2x96xf32> to vector<2x32xf32>
    %372 = arith.mulf %368, %371 : vector<2x32xf32>
    %373 = arith.addf %370, %372 : vector<2x32xf32>
    %374 = math.tanh %373 : vector<2x32xf32>
    %375 = arith.subf %356, %374 : vector<2x32xf32>
    %376 = arith.mulf %369, %375 : vector<2x32xf32>
    %377 = arith.addf %374, %376 : vector<2x32xf32>
    %378 = arith.truncf %377 : vector<2x32xf32> to vector<2x32xbf16>
    %cst_81 = arith.constant dense<0.000000e+00> : vector<2x96xf32>
    %379 = tpu.matmul %378, %219, %cst_81 {dimension_numbers = #tpu.dot_dimension_numbers<[1], [0], [0], [1], [0, 0, 1, 1], [], []>} : vector<2x32xbf16>, vector<32x96xbf16>, vector<2x96xf32> -> vector<2x96xf32>
    %380 = arith.addf %379, %225 : vector<2x96xf32>
    %381 = vector.extract_strided_slice %246 {offsets = [0, 0], sizes = [2, 64], strides = [1, 1]} : vector<2x96xf32> to vector<2x64xf32>
    %382 = vector.extract_strided_slice %380 {offsets = [0, 0], sizes = [2, 64], strides = [1, 1]} : vector<2x96xf32> to vector<2x64xf32>
    %383 = arith.addf %381, %382 : vector<2x64xf32>
    %384 = arith.negf %383 : vector<2x64xf32>
    %385 = math.exp %384 : vector<2x64xf32>
    %cst_82 = arith.constant 1.000000e+00 : f32
    %386 = vector.broadcast %cst_82 : f32 to vector<2x64xf32>
    %387 = arith.addf %386, %385 : vector<2x64xf32>
    %388 = arith.divf %386, %387 : vector<2x64xf32>
    %389 = vector.extract_strided_slice %388 {offsets = [0, 0], sizes = [2, 32], strides = [1, 1]} : vector<2x64xf32> to vector<2x32xf32>
    %390 = vector.extract_strided_slice %388 {offsets = [0, 32], sizes = [2, 32], strides = [1, 1]} : vector<2x64xf32> to vector<2x32xf32>
    %391 = vector.extract_strided_slice %246 {offsets = [0, 64], sizes = [2, 32], strides = [1, 1]} : vector<2x96xf32> to vector<2x32xf32>
    %392 = vector.extract_strided_slice %380 {offsets = [0, 64], sizes = [2, 32], strides = [1, 1]} : vector<2x96xf32> to vector<2x32xf32>
    %393 = arith.mulf %389, %392 : vector<2x32xf32>
    %394 = arith.addf %391, %393 : vector<2x32xf32>
    %395 = math.tanh %394 : vector<2x32xf32>
    %396 = arith.subf %377, %395 : vector<2x32xf32>
    %397 = arith.mulf %390, %396 : vector<2x32xf32>
    %398 = arith.addf %395, %397 : vector<2x32xf32>
    %399 = arith.truncf %398 : vector<2x32xf32> to vector<2x32xbf16>
    %cst_83 = arith.constant dense<0.000000e+00> : vector<2x96xf32>
    %400 = tpu.matmul %399, %219, %cst_83 {dimension_numbers = #tpu.dot_dimension_numbers<[1], [0], [0], [1], [0, 0, 1, 1], [], []>} : vector<2x32xbf16>, vector<32x96xbf16>, vector<2x96xf32> -> vector<2x96xf32>
    %401 = arith.addf %400, %225 : vector<2x96xf32>
    %402 = vector.extract_strided_slice %249 {offsets = [0, 0], sizes = [2, 64], strides = [1, 1]} : vector<2x96xf32> to vector<2x64xf32>
    %403 = vector.extract_strided_slice %401 {offsets = [0, 0], sizes = [2, 64], strides = [1, 1]} : vector<2x96xf32> to vector<2x64xf32>
    %404 = arith.addf %402, %403 : vector<2x64xf32>
    %405 = arith.negf %404 : vector<2x64xf32>
    %406 = math.exp %405 : vector<2x64xf32>
    %cst_84 = arith.constant 1.000000e+00 : f32
    %407 = vector.broadcast %cst_84 : f32 to vector<2x64xf32>
    %408 = arith.addf %407, %406 : vector<2x64xf32>
    %409 = arith.divf %407, %408 : vector<2x64xf32>
    %410 = vector.extract_strided_slice %409 {offsets = [0, 0], sizes = [2, 32], strides = [1, 1]} : vector<2x64xf32> to vector<2x32xf32>
    %411 = vector.extract_strided_slice %409 {offsets = [0, 32], sizes = [2, 32], strides = [1, 1]} : vector<2x64xf32> to vector<2x32xf32>
    %412 = vector.extract_strided_slice %249 {offsets = [0, 64], sizes = [2, 32], strides = [1, 1]} : vector<2x96xf32> to vector<2x32xf32>
    %413 = vector.extract_strided_slice %401 {offsets = [0, 64], sizes = [2, 32], strides = [1, 1]} : vector<2x96xf32> to vector<2x32xf32>
    %414 = arith.mulf %410, %413 : vector<2x32xf32>
    %415 = arith.addf %412, %414 : vector<2x32xf32>
    %416 = math.tanh %415 : vector<2x32xf32>
    %417 = arith.subf %398, %416 : vector<2x32xf32>
    %418 = arith.mulf %411, %417 : vector<2x32xf32>
    %419 = arith.addf %416, %418 : vector<2x32xf32>
    %cst_85 = arith.constant dense<0.000000e+00> : vector<32xf32>
    %420 = vector.multi_reduction <add>, %419, %cst_85 [0] : vector<2x32xf32> to vector<32xf32>
    %421 = vector.shape_cast %420 : vector<32xf32> to vector<1x32xf32>
    %cst_86 = arith.constant 2.000000e+00 : f32
    %422 = vector.broadcast %cst_86 : f32 to vector<1x32xf32>
    %423 = arith.divf %421, %422 : vector<1x32xf32>
    %424 = vector.broadcast %423 : vector<1x32xf32> to vector<2x32xf32>
    %425 = arith.subf %419, %424 : vector<2x32xf32>
    %426 = arith.mulf %425, %425 : vector<2x32xf32>
    %cst_87 = arith.constant dense<0.000000e+00> : vector<32xf32>
    %427 = vector.multi_reduction <add>, %426, %cst_87 [0] : vector<2x32xf32> to vector<32xf32>
    %428 = vector.shape_cast %427 : vector<32xf32> to vector<1x32xf32>
    %cst_88 = arith.constant 2.000000e+00 : f32
    %429 = vector.broadcast %cst_88 : f32 to vector<1x32xf32>
    %430 = arith.divf %428, %429 : vector<1x32xf32>
    %431 = vector.broadcast %423 : vector<1x32xf32> to vector<2x32xf32>
    %432 = arith.subf %419, %431 : vector<2x32xf32>
    %cst_89 = arith.constant 9.99999974E-6 : f32
    %433 = vector.broadcast %cst_89 : f32 to vector<1x32xf32>
    %434 = arith.addf %430, %433 : vector<1x32xf32>
    %435 = math.rsqrt %434 : vector<1x32xf32>
    %436 = vector.broadcast %435 : vector<1x32xf32> to vector<2x32xf32>
    %437 = arith.mulf %432, %436 : vector<2x32xf32>
    %c0_90 = arith.constant 0 : index
    %c0_91 = arith.constant 0 : index
    %438 = vector.load %arg11[%c0_90, %c0_91] : memref<1x32xf32, #tpu.memory_space<vmem>>, vector<1x32xf32>
    %439 = vector.broadcast %438 : vector<1x32xf32> to vector<2x32xf32>
    %440 = arith.mulf %437, %439 : vector<2x32xf32>
    %c0_92 = arith.constant 0 : index
    %c0_93 = arith.constant 0 : index
    %441 = vector.load %arg12[%c0_92, %c0_93] : memref<1x32xf32, #tpu.memory_space<vmem>>, vector<1x32xf32>
    %442 = vector.broadcast %441 : vector<1x32xf32> to vector<2x32xf32>
    %443 = arith.addf %440, %442 : vector<2x32xf32>
    %c0_94 = arith.constant 0 : index
    %c0_95 = arith.constant 0 : index
    %444 = vector.load %arg13[%c0_94, %c0_95] : memref<32x24xf32, #tpu.memory_space<vmem>>, vector<32x24xf32>
    %cst_96 = arith.constant dense<0.000000e+00> : vector<2x24xf32>
    %445 = tpu.matmul %443, %444, %cst_96 {dimension_numbers = #tpu.dot_dimension_numbers<[1], [0], [0], [1], [0, 0, 1, 1], [], []>} : vector<2x32xf32>, vector<32x24xf32>, vector<2x24xf32> -> vector<2x24xf32>
    %c0_97 = arith.constant 0 : index
    %c0_98 = arith.constant 0 : index
    %446 = vector.load %arg14[%c0_97, %c0_98] : memref<1x24xf32, #tpu.memory_space<vmem>>, vector<1x24xf32>
    %447 = vector.broadcast %446 : vector<1x24xf32> to vector<2x24xf32>
    %448 = arith.addf %445, %447 : vector<2x24xf32>
    %cst_99 = arith.constant 0.000000e+00 : f32
    %449 = vector.broadcast %cst_99 : f32 to vector<2x24xf32>
    %450 = arith.maximumf %448, %449 : vector<2x24xf32>
    %cst_100 = arith.constant dense<0.000000e+00> : vector<24xf32>
    %451 = vector.multi_reduction <add>, %450, %cst_100 [0] : vector<2x24xf32> to vector<24xf32>
    %452 = vector.shape_cast %451 : vector<24xf32> to vector<1x24xf32>
    %cst_101 = arith.constant 2.000000e+00 : f32
    %453 = vector.broadcast %cst_101 : f32 to vector<1x24xf32>
    %454 = arith.divf %452, %453 : vector<1x24xf32>
    %455 = vector.broadcast %454 : vector<1x24xf32> to vector<2x24xf32>
    %456 = arith.subf %450, %455 : vector<2x24xf32>
    %457 = arith.mulf %456, %456 : vector<2x24xf32>
    %cst_102 = arith.constant dense<0.000000e+00> : vector<24xf32>
    %458 = vector.multi_reduction <add>, %457, %cst_102 [0] : vector<2x24xf32> to vector<24xf32>
    %459 = vector.shape_cast %458 : vector<24xf32> to vector<1x24xf32>
    %cst_103 = arith.constant 2.000000e+00 : f32
    %460 = vector.broadcast %cst_103 : f32 to vector<1x24xf32>
    %461 = arith.divf %459, %460 : vector<1x24xf32>
    %462 = vector.broadcast %454 : vector<1x24xf32> to vector<2x24xf32>
    %463 = arith.subf %450, %462 : vector<2x24xf32>
    %cst_104 = arith.constant 9.99999974E-6 : f32
    %464 = vector.broadcast %cst_104 : f32 to vector<1x24xf32>
    %465 = arith.addf %461, %464 : vector<1x24xf32>
    %466 = math.rsqrt %465 : vector<1x24xf32>
    %467 = vector.broadcast %466 : vector<1x24xf32> to vector<2x24xf32>
    %468 = arith.mulf %463, %467 : vector<2x24xf32>
    %c0_105 = arith.constant 0 : index
    %c0_106 = arith.constant 0 : index
    %469 = vector.load %arg15[%c0_105, %c0_106] : memref<1x24xf32, #tpu.memory_space<vmem>>, vector<1x24xf32>
    %470 = vector.broadcast %469 : vector<1x24xf32> to vector<2x24xf32>
    %471 = arith.mulf %468, %470 : vector<2x24xf32>
    %c0_107 = arith.constant 0 : index
    %c0_108 = arith.constant 0 : index
    %472 = vector.load %arg16[%c0_107, %c0_108] : memref<1x24xf32, #tpu.memory_space<vmem>>, vector<1x24xf32>
    %473 = vector.broadcast %472 : vector<1x24xf32> to vector<2x24xf32>
    %474 = arith.addf %471, %473 : vector<2x24xf32>
    %c0_109 = arith.constant 0 : index
    %c0_110 = arith.constant 0 : index
    %475 = vector.load %arg17[%c0_109, %c0_110] : memref<24x4xf32, #tpu.memory_space<vmem>>, vector<24x4xf32>
    %cst_111 = arith.constant dense<0.000000e+00> : vector<2x4xf32>
    %476 = tpu.matmul %474, %475, %cst_111 {dimension_numbers = #tpu.dot_dimension_numbers<[1], [0], [0], [1], [0, 0, 1, 1], [], []>} : vector<2x24xf32>, vector<24x4xf32>, vector<2x4xf32> -> vector<2x4xf32>
    %c0_112 = arith.constant 0 : index
    %c0_113 = arith.constant 0 : index
    %477 = vector.load %arg18[%c0_112, %c0_113] : memref<1x4xf32, #tpu.memory_space<vmem>>, vector<1x4xf32>
    %478 = vector.broadcast %477 : vector<1x4xf32> to vector<2x4xf32>
    %479 = arith.addf %476, %478 : vector<2x4xf32>
    %c0_114 = arith.constant 0 : index
    %c0_115 = arith.constant 0 : index
    %480 = vector.load %arg19[%c0_114, %c0_115] : memref<2x4xf32, #tpu.memory_space<vmem>>, vector<2x4xf32>
    tpu.vector_store %arg19[%c0_114, %c0_115], %479 {strides = array<i32>} : memref<2x4xf32, #tpu.memory_space<vmem>>, vector<2x4xf32>,
    return
  }
  func.func @transform_0(%arg0: i32) -> (i32, i32, i32) {
    %c0_i32 = arith.constant 0 : i32
    %c0_i32_0 = arith.constant 0 : i32
    %c0_i32_1 = arith.constant 0 : i32
    %c0_i32_2 = arith.constant 0 : i32
    return %c0_i32, %c0_i32_0, %c0_i32_1 : i32, i32, i32
  }
  func.func @transform_1(%arg0: i32) -> (i32, i32, i32) {
    %c0_i32 = arith.constant 0 : i32
    %c0_i32_0 = arith.constant 0 : i32
    %c0_i32_1 = arith.constant 0 : i32
    %c0_i32_2 = arith.constant 0 : i32
    return %c0_i32, %c0_i32_0, %c0_i32_1 : i32, i32, i32
  }
  func.func @transform_2(%arg0: i32) -> (i32, i32) {
    %c0_i32 = arith.constant 0 : i32
    %c0_i32_0 = arith.constant 0 : i32
    %c0_i32_1 = arith.constant 0 : i32
    return %c0_i32, %c0_i32_0 : i32, i32
  }
  func.func @transform_3(%arg0: i32) -> (i32, i32) {
    %c0_i32 = arith.constant 0 : i32
    %c0_i32_0 = arith.constant 0 : i32
    %c0_i32_1 = arith.constant 0 : i32
    return %c0_i32, %c0_i32_0 : i32, i32
  }
  func.func @transform_4(%arg0: i32) -> (i32, i32) {
    %c0_i32 = arith.constant 0 : i32
    %c0_i32_0 = arith.constant 0 : i32
    %c0_i32_1 = arith.constant 0 : i32
    return %c0_i32, %c0_i32_0 : i32, i32
  }
  func.func @transform_5(%arg0: i32) -> (i32, i32) {
    %c0_i32 = arith.constant 0 : i32
    %c0_i32_0 = arith.constant 0 : i32
    %c0_i32_1 = arith.constant 0 : i32
    return %c0_i32, %c0_i32_0 : i32, i32
  }
  func.func @transform_6(%arg0: i32) -> (i32, i32) {
    %c0_i32 = arith.constant 0 : i32
    %c0_i32_0 = arith.constant 0 : i32
    %c0_i32_1 = arith.constant 0 : i32
    return %c0_i32, %c0_i32_0 : i32, i32
  }
  func.func @transform_7(%arg0: i32) -> (i32, i32) {
    %c0_i32 = arith.constant 0 : i32
    %c0_i32_0 = arith.constant 0 : i32
    %c0_i32_1 = arith.constant 0 : i32
    return %c0_i32, %c0_i32_0 : i32, i32
  }
  func.func @transform_8(%arg0: i32) -> (i32, i32) {
    %c0_i32 = arith.constant 0 : i32
    %c0_i32_0 = arith.constant 0 : i32
    %c0_i32_1 = arith.constant 0 : i32
    return %c0_i32, %c0_i32_0 : i32, i32
  }
  func.func @transform_9(%arg0: i32) -> (i32, i32) {
    %c0_i32 = arith.constant 0 : i32
    %c0_i32_0 = arith.constant 0 : i32
    %c0_i32_1 = arith.constant 0 : i32
    return %c0_i32, %c0_i32_0 : i32, i32
  }
  func.func @transform_10(%arg0: i32) -> (i32, i32) {
    %c0_i32 = arith.constant 0 : i32
    %c0_i32_0 = arith.constant 0 : i32
    %c0_i32_1 = arith.constant 0 : i32
    return %c0_i32, %c0_i32_0 : i32, i32
  }
  func.func @transform_11(%arg0: i32) -> (i32, i32) {
    %c0_i32 = arith.constant 0 : i32
    %c0_i32_0 = arith.constant 0 : i32
    %c0_i32_1 = arith.constant 0 : i32
    return %c0_i32, %c0_i32_0 : i32, i32
  }
  func.func @transform_12(%arg0: i32) -> (i32, i32) {
    %c0_i32 = arith.constant 0 : i32
    %c0_i32_0 = arith.constant 0 : i32
    %c0_i32_1 = arith.constant 0 : i32
    return %c0_i32, %c0_i32_0 : i32, i32
  }
  func.func @transform_13(%arg0: i32) -> (i32, i32) {
    %c0_i32 = arith.constant 0 : i32
    %c0_i32_0 = arith.constant 0 : i32
    %c0_i32_1 = arith.constant 0 : i32
    return %c0_i32, %c0_i32_0 : i32, i32
  }
  func.func @transform_14(%arg0: i32) -> (i32, i32) {
    %c0_i32 = arith.constant 0 : i32
    %c0_i32_0 = arith.constant 0 : i32
    %c0_i32_1 = arith.constant 0 : i32
    return %c0_i32, %c0_i32_0 : i32, i32
  }
  func.func @transform_15(%arg0: i32) -> (i32, i32) {
    %c0_i32 = arith.constant 0 : i32
    %c0_i32_0 = arith.constant 0 : i32
    %c0_i32_1 = arith.constant 0 : i32
    return %c0_i32, %c0_i32_0 : i32, i32
  }
  func.func @transform_16(%arg0: i32) -> (i32, i32) {
    %c0_i32 = arith.constant 0 : i32
    %c0_i32_0 = arith.constant 0 : i32
    %c0_i32_1 = arith.constant 0 : i32
    return %c0_i32, %c0_i32_0 : i32, i32
  }
  func.func @transform_17(%arg0: i32) -> (i32, i32) {
    %c0_i32 = arith.constant 0 : i32
    %c0_i32_0 = arith.constant 0 : i32
    %c0_i32_1 = arith.constant 0 : i32
    return %c0_i32, %c0_i32_0 : i32, i32
  }
  func.func @transform_18(%arg0: i32) -> (i32, i32) {
    %c0_i32 = arith.constant 0 : i32
    %c0_i32_0 = arith.constant 0 : i32
    %c0_i32_1 = arith.constant 0 : i32
    return %c0_i32, %c0_i32_0 : i32, i32
  }
}

</mosaic_0001>

<bundles_post_ra>
// kernel: gru_v2_forward.1
= control target key start
LH: loop header
LB: loop body
LE: loop exit
PB: predicated region body
PF: predicated region fallthrough
CT: control target
= control target key end

     0   :  { %s3549_s0 = inlined_call_operand.vmem [shape: f32[8,2,8], index: 0, kind: input, shape index: {}]   ;;  %s3550_s1 = inlined_call_operand.vmem [shape: f32[2,2,32], index: 1, kind: input, shape index: {}]   ;;  %s3551_s2 = inlined_call_operand.vmem [shape: bf16[8,96], index: 2, kind: input, shape index: {}]   ;;  %s3552_s3 = inlined_call_operand.vmem [shape: bf16[32,96], index: 3, kind: input, shape index: {}]   ;;  %s3553_s4 = inlined_call_operand.vmem [shape: f32[1,96], index: 4, kind: input, shape index: {}]   ;;  %s3554_s5 = inlined_call_operand.vmem [shape: f32[1,96], index: 5, kind: input, shape index: {}]   ;;  %s3555_s6 = inlined_call_operand.vmem [shape: bf16[32,96], index: 6, kind: input, shape index: {}]   ;;  %s3556_s7 = inlined_call_operand.vmem [shape: bf16[32,96], index: 7, kind: input, shape index: {}]   ;;  %s3557_s8 = inlined_call_operand.vmem [shape: f32[1,96], index: 8, kind: input, shape index: {}]   ;;  %s3558_s9 = inlined_call_operand.vmem [shape: f32[1,96], index: 9, kind: input, shape index: {}]   ;;  %s3559_s10 = inlined_call_operand.vmem [shape: f32[1,32], index: 10, kind: input, shape index: {}]   ;;  %s3560_s11 = inlined_call_operand.vmem [shape: f32[1,32], index: 11, kind: input, shape index: {}]   ;;  %s3561_s12 = inlined_call_operand.vmem [shape: f32[32,24], index: 12, kind: input, shape index: {}]   ;;  %s3562_s13 = inlined_call_operand.vmem [shape: f32[1,24], index: 13, kind: input, shape index: {}]   ;;  %s3563_s14 = inlined_call_operand.vmem [shape: f32[1,24], index: 14, kind: input, shape index: {}]   ;;  %s3564_s15 = inlined_call_operand.vmem [shape: f32[1,24], index: 15, kind: input, shape index: {}]   ;;  %s3565_s16 = inlined_call_operand.vmem [shape: f32[24,4], index: 16, kind: input, shape index: {}]   ;;  %s3566_s17 = inlined_call_operand.vmem [shape: f32[1,4], index: 17, kind: input, shape index: {}]   ;;  %s3567_s18 = inlined_call_operand.hbm [shape: f32[2,4], index: 18, kind: output, shape index: {}]  }
   0x1   :  { %3570 = sst [smem:[#allocation5_spill]] %s3549_s0 }
   0x2   :  { %3571 = sst [smem:[#allocation6_spill]] %s3550_s1 }
   0x3   :  { %3572 = sst [smem:[#allocation7_spill]] %s3551_s2 }
   0x4   :  { %s3573_s29 = sld [smem:[#allocation7_spill]]  ;;  %vm100_vm0 = vcmask 1043456   ;;  %v2904_v1 = vmov 0.0   ;;  %vm2905_vm1 = vmmov 0   ;;  %s3574_s19 = sld [smem:[#allocation5_spill]]  ;;  %vm96_vm2 = vcmask 64512  }
   0x5   :  { %2498 = vmatprep.subr.bf16.mxu0 %v2904_v1  ;;  %2500 = vmatprep.mubr.msk.bf16.mxu0 %vm2905_vm1, %v2904_v1 }
   0x6   :  { %2504 = vmatprep.subr.bf16.mxu1 %v2904_v1  ;;  %2506 = vmatprep.mubr.msk.bf16.mxu1 %vm2905_vm1, %v2904_v1 }
   0xa   :  { %v76_v0 = vld [vmem:[%s3573_s29] sm:$0xf]  ;;  %v2328_v5 = vld [vmem:[%s3574_s19 + $0x4] sm:$0x3] }
   0xb   :  { %v3010_v2 = vsel %vm100_vm0, %v76_v0, 0  ;;  %v61_v3 = vld [vmem:[%s3574_s19] sm:$0x3] }
   0xc   :  { %2499 = vmatpush3.bf16.msra.mxu0 %v3010_v2  ;;  %v95_v4 = vpack.c.bf16 %v61_v3, %v61_v3  ;;  %2505 = vmatpush3.bf16.msra.mxu1 %v3010_v2 }
   0xd   :  { %2510 = vmatprep.subr.bf16.mxu0 %v2904_v1  ;;  %2516 = vmatprep.subr.bf16.mxu1 %v2904_v1 }
   0xf   :  { %2501 = vmatmul.mubr.msk.bf16.vlgmr.msra.gmra.mrb[0].mxu0 %vm96_vm2, %v95_v4 }
  0x10   :  { %2511 = vmatpush3.bf16.msra.mxu0 %v3010_v2  ;;  %2512 = vmatprep.mubr.msk.bf16.mxu0 %vm2905_vm1, %v2904_v1 }
  0x11   :  { %2522 = vmatprep.subr.bf16.mxu0 %v2904_v1 }
  0x12   :  { %23 = vsyncpa [#allocation3], 0  ;;  %v188_v6 = vpack.c.bf16 %v2328_v5, %v2328_v5  ;;  %v2330_v7 = vld [vmem:[%s3574_s19 + $0x8] sm:$0x3]  ;;  %v2332_v9 = vld [vmem:[%s3574_s19 + $0xc] sm:$0x3] }
  0x13   :  { %v276_v8 = vpack.c.bf16 %v2330_v7, %v2330_v7  ;;  %v364_v10 = vpack.c.bf16 %v2332_v9, %v2332_v9  ;;  %v3051_v11 = vld [vmem:[%s3552_s3] sm:$0xff]   ;;  %v3058_v12 = vld [vmem:[%s3552_s3 + $0x8] sm:$0xff]   ;;  %s3575_s30 = sld [smem:[#allocation6_spill]]  ;;  %vm466_vm3 = vcmask 261120   ;;  %s2906_s1 = smov 64   ;;  %vm2059_vm4 = vcmask 779776  }
  0x14   :  { %v3084_v31 = vld [vmem:[%s3554_s5] ss:$0 sm:$0xff]  ;;  %v2327_v51 = vld [vmem:[%s3574_s19 + $0x2] sm:$0x3]  ;;  %v2329_v53 = vld [vmem:[%s3574_s19 + $0x6] sm:$0x3] }
  0x15   :  { %v3091_v37 = vld [vmem:[%s3553_s4] ss:$0 sm:$0xff]  ;;  %s2907_s4 = smov 32   ;;  %v144_v52 = vpack.c.bf16 %v2327_v51, %v2327_v51  ;;  %v232_v56 = vpack.c.bf16 %v2329_v53, %v2329_v53  ;;  %v2331_v57 = vld [vmem:[%s3574_s19 + $0xa] sm:$0x3]  ;;  %vm2189_vm5 = vcmask 189440  }
  0x16   :  { %v320_v58 = vpack.c.bf16 %v2331_v57, %v2331_v57  ;;  %v2333_v59 = vld [vmem:[%s3574_s19 + $0xe] sm:$0x3]  ;;  %s2908_s19 = smov 96   ;;  %vm2237_vm6 = vcmask 195584   ;;  %s2910_s23 = smov [#allocation2]   ;;  %vm2311_vm7 = vcmask 25600  }
  0x17   :  { %2513 = vmatmul.mubr.msk.bf16.vlgmr.msra.gmra.mrb[4].mxu0 %vm96_vm2, %v188_v6  ;;  %2507 = vmatmul.mubr.msk.bf16.vlgmr.msra.gmra.mrb[0].mxu1 %vm96_vm2, %v144_v52  ;;  %v408_v60 = vpack.c.bf16 %v2333_v59, %v2333_v59 }
  0x18   :  { %2523 = vmatpush3.bf16.msra.mxu0 %v3010_v2  ;;  %2524 = vmatprep.mubr.msk.bf16.mxu0 %vm2905_vm1, %v2904_v1 }
  0x19   :  { %2534 = vmatprep.subr.bf16.mxu0 %v2904_v1  ;;  %v452_v13 = vld [vmem:[%s3575_s30] sm:$0x3]  ;;  %2517 = vmatpush3.bf16.msra.mxu1 %v3010_v2 }
  0x1a   :  { %v453_v14 = vpack.c.bf16 %v452_v13, %v452_v13  ;;  %2518 = vmatprep.mubr.msk.bf16.mxu1 %vm2905_vm1, %v2904_v1  ;;  %2528 = vmatprep.subr.bf16.mxu1 %v2904_v1 }
  0x1f   :  { %2525 = vmatmul.mubr.msk.bf16.vlgmr.msra.gmra.mrb[8].mxu0 %vm96_vm2, %v276_v8  ;;  %2519 = vmatmul.mubr.msk.bf16.vlgmr.msra.gmra.mrb[4].mxu1 %vm96_vm2, %v232_v56 }
  0x20   :  { %2535 = vmatpush3.bf16.msra.mxu0 %v3010_v2  ;;  %2536 = vmatprep.mubr.msk.bf16.mxu0 %vm2905_vm1, %v2904_v1 }
  0x21   :  { %2546 = vmatprep.subr.bf16.mxu0 %v2904_v1  ;;  %2529 = vmatpush3.bf16.msra.mxu1 %v3010_v2 }
  0x22   :  { %2530 = vmatprep.mubr.msk.bf16.mxu1 %vm2905_vm1, %v2904_v1  ;;  %2540 = vmatprep.subr.bf16.mxu1 %v2904_v1 }
  0x27   :  { %2537 = vmatmul.mubr.msk.bf16.vlgmr.msra.gmra.mrb[12].mxu0 %vm96_vm2, %v364_v10  ;;  %2531 = vmatmul.mubr.msk.bf16.vlgmr.msra.gmra.mrb[8].mxu1 %vm96_vm2, %v320_v58 }
  0x28   :  { %2547 = vmatpush3.bf16.msra.mxu0 %v3051_v11  ;;  %2550 = vmatprep.mubr.msk.bf16.mxu0 %vm2905_vm1, %v2904_v1 }
  0x29   :  { %2548 = vmatprep.subr.bf16.mxu0 %v2904_v1  ;;  %2541 = vmatpush3.bf16.msra.mxu1 %v3010_v2 }
  0x2a   :  { %2542 = vmatprep.mubr.msk.bf16.mxu1 %vm2905_vm1, %v2904_v1  ;;  %2554 = vmatprep.subr.bf16.mxu1 %v2904_v1 }
  0x2c   :  { %2549 = vmatpush3.bf16.msra.mxu0 %v3058_v12 }
  0x2d   :  { %2562 = vmatprep.subr.bf16.mxu0 %v2904_v1 }
  0x2f   :  { %2551 = vmatmul.mubr.msk.bf16.vlgmr.msra.gmra.mrb[16].mxu0 %vm466_vm3, %v453_v14  ;;  %2543 = vmatmul.mubr.msk.bf16.vlgmr.msra.gmra.mrb[12].mxu1 %vm96_vm2, %v408_v60 }
  0x30   :  { %2563 = vmatpush3.bf16.msra.mxu0 %v3051_v11  ;;  %2566 = vmatprep.mubr.msk.bf16.mxu0 %vm2905_vm1, %v2904_v1 }
  0x31   :  { %2564 = vmatprep.subr.bf16.mxu0 %v2904_v1  ;;  %2555 = vmatpush3.bf16.msra.mxu1 %v3051_v11 }
  0x32   :  { %2558 = vmatprep.mubr.msk.bf16.mxu1 %vm2905_vm1, %v2904_v1  ;;  %2556 = vmatprep.subr.bf16.mxu1 %v2904_v1 }
  0x34   :  { %2565 = vmatpush3.bf16.msra.mxu0 %v3058_v12 }
  0x35   :  { %2578 = vmatprep.subr.bf16.mxu0 %v2904_v1  ;;  %2557 = vmatpush3.bf16.msra.mxu1 %v3058_v12 }
  0x36   :  { %2570 = vmatprep.subr.bf16.mxu1 %v2904_v1 }
  0xe2   :  { %v138_v15 = vpop.f32.mrb[0].mxu0 }
  0xe3   :  { %v2502_v16 = vpop.f32.mrb[1].mxu0  ;;  %v139_v38 = vadd.f32 %v3091_v37, %v138_v15 }
  0xe4   :  { %v141_v17 = vpop.f32.mrb[2].mxu0 }
  0xe5   :  { %v2503_v18 = vpop.f32.mrb[3].mxu0 }
  0xea   :  { %v3075_v19 = vpop.f32.mrb[4].mxu0  ;;  %v182_v0 = vpop.f32.mrb[0].mxu1 }
  0xeb   :  { %v2514_v20 = vpop.f32.mrb[5].mxu0  ;;  %v2508_v2 = vpop.f32.mrb[1].mxu1  ;;  %v227_v53 = vadd.f32 %v3091_v37, %v3075_v19 }
  0xec   :  { %v229_v21 = vpop.f32.mrb[6].mxu0  ;;  %v185_v3 = vpop.f32.mrb[2].mxu1 }
  0xed   :  { %v2515_v22 = vpop.f32.mrb[7].mxu0  ;;  %v2509_v4 = vpop.f32.mrb[3].mxu1 }
  0xf2   :  { %v3077_v23 = vpop.f32.mrb[8].mxu0  ;;  %v3133_v5 = vpop.f32.mrb[4].mxu1 }
  0xf3   :  { %v2526_v24 = vpop.f32.mrb[9].mxu0  ;;  %v2520_v6 = vpop.f32.mrb[5].mxu1 }
  0xf4   :  { %v317_v25 = vpop.f32.mrb[10].mxu0  ;;  %v273_v7 = vpop.f32.mrb[6].mxu1 }
  0xf5   :  { %v2527_v26 = vpop.f32.mrb[11].mxu0  ;;  %v2521_v8 = vpop.f32.mrb[7].mxu1 }
  0xfa   :  { %v3079_v27 = vpop.f32.mrb[12].mxu0  ;;  %v3135_v9 = vpop.f32.mrb[8].mxu1 }
  0xfb   :  { %v2538_v28 = vpop.f32.mrb[13].mxu0  ;;  %v2532_v10 = vpop.f32.mrb[9].mxu1 }
  0xfc   :  { %v405_v29 = vpop.f32.mrb[14].mxu0  ;;  %v183_v28 = vadd.f32 %v3091_v37, %v182_v0 }
  0xfd   :  { %v2539_v30 = vpop.f32.mrb[15].mxu0 }
 0x102   :  { %v504_v32 = vpop.f32.mrb[16].mxu0 }
 0x103   :  { %v505_v33 = vadd.f32 %v3084_v31, %v504_v32  ;;  %v2552_v34 = vpop.f32.mrb[17].mxu0 }
 0x104   :  { %v507_v35 = vpop.f32.mrb[18].mxu0 }
 0x105   :  { %518 = vrot.lane.b32.xlu0 %v505_v33, %s2906_s1  ;;  %v2553_v36 = vpop.f32.mrb[19].mxu0  ;;  %v510_v39 = vadd.f32 %v505_v33, %v139_v38 }
 0x107   :  { %v2347_v40 = vmul.f32 -1.442695, %v510_v39 }
 0x109   :  { %2780 = vpow2.f32 %v2347_v40 }
 0x113   :  { %v2781_v41 = vpop.eup %2780 }
 0x114   :  { %v514_v42 = vadd.f32 1.0, %v2781_v41 }
 0x116   :  { %2782 = vrcp.f32 %v514_v42 }
 0x120   :  { %v2783_v43 = vpop.eup %2782 }
 0x177   :  { %v519_v44 = vpop.permute.xlu0 %518 }
 0x178   :  { %v521_v45 = vmul.f32 %v2783_v43, %v519_v44 }
 0x17a   :  { %523 = vrot.lane.b32.xlu0 %v521_v45, %s2906_s1 }
 0x1ec   :  { %v524_v46 = vpop.permute.xlu0 %523 }
 0x1ed   :  { %v526_v47 = vadd.f32 %v524_v46, %v139_v38 }
 0x1ef   :  { %2784 = vtanh.f32 %v526_v47 }
 0x1f9   :  { %v2785_v48 = vpop.eup %2784 }
 0x1fa   :  { %529 = vrot.lane.b32.xlu1 %v2785_v48, %s2906_s1 }
 0x26c   :  { %v530_v49 = vpop.permute.xlu1 %529 }
 0x26d   :  { %v532_v50 = vsub.f32 %v452_v13, %v530_v49  ;;  %v361_v13 = vpop.f32.mrb[10].mxu1 }
 0x26e   :  { %v2533_v14 = vpop.f32.mrb[11].mxu1 }
 0x26f   :  { %534 = vrot.lane.b32.xlu1 %v532_v50, %s2907_s4  ;;  %v3137_v15 = vpop.f32.mrb[12].mxu1 }
 0x270   :  { %v2544_v16 = vpop.f32.mrb[13].mxu1 }
 0x271   :  { %v449_v17 = vpop.f32.mrb[14].mxu1 }
 0x272   :  { %v2545_v18 = vpop.f32.mrb[15].mxu1  ;;  %v271_v17 = vadd.f32 %v3091_v37, %v3133_v5 }
 0x2e1   :  { %v535_v54 = vpop.permute.xlu1 %534 }
 0x2e2   :  { %v537_v55 = vmul.f32 %v2783_v43, %v535_v54 }
 0x2e4   :  { %539 = vrot.lane.b32.xlu0 %v537_v55, %s2907_s4 }
 0x356   :  { %v540_v61 = vpop.permute.xlu0 %539 }
 0x357   :  { %v542_v62 = vadd.f32 %v2785_v48, %v540_v61 }
 0x359   :  { %v543_v63 = vpack.c.bf16 %v542_v62, %v542_v62 }
 0x35b   :  { %545 = vrot.lane.b32.xlu1 %v543_v63, %s2906_s1 }
 0x3cd   :  { %v3139_v20 = vpop.permute.xlu1 %545 }
 0x3ce   :  { %2559 = vmatmul.mubr.msk.bf16.vlgmr.msra.gmra.mrb[16].mxu1 %vm466_vm3, %v3139_v20 }
 0x3cf   :  { %2571 = vmatpush3.bf16.msra.mxu1 %v3051_v11  ;;  %2574 = vmatprep.mubr.msk.bf16.mxu1 %vm2905_vm1, %v2904_v1 }
 0x3d0   :  { %2572 = vmatprep.subr.bf16.mxu1 %v2904_v1 }
 0x3d3   :  { %2573 = vmatpush3.bf16.msra.mxu1 %v3058_v12 }
 0x3d4   :  { %2586 = vmatprep.subr.bf16.mxu1 %v2904_v1 }
 0x4a1   :  { %v584_v21 = vpop.f32.mrb[16].mxu1 }
 0x4a2   :  { %v585_v22 = vadd.f32 %v3084_v31, %v584_v21  ;;  %v2560_v24 = vpop.f32.mrb[17].mxu1 }
 0x4a3   :  { %v587_v25 = vpop.f32.mrb[18].mxu1 }
 0x4a4   :  { %598 = vrot.lane.b32.xlu0 %v585_v22, %s2906_s1  ;;  %v2561_v26 = vpop.f32.mrb[19].mxu1  ;;  %v590_v29 = vadd.f32 %v585_v22, %v183_v28 }
 0x4a6   :  { %v2349_v30 = vmul.f32 -1.442695, %v590_v29 }
 0x4a8   :  { %2786 = vpow2.f32 %v2349_v30 }
 0x4b2   :  { %v2787_v32 = vpop.eup %2786 }
 0x4b3   :  { %v594_v33 = vadd.f32 1.0, %v2787_v32 }
 0x4b5   :  { %2788 = vrcp.f32 %v594_v33 }
 0x4bf   :  { %v2789_v34 = vpop.eup %2788 }
 0x516   :  { %v599_v35 = vpop.permute.xlu0 %598 }
 0x517   :  { %v601_v36 = vmul.f32 %v2789_v34, %v599_v35 }
 0x519   :  { %603 = vrot.lane.b32.xlu1 %v601_v36, %s2906_s1 }
 0x58b   :  { %v604_v38 = vpop.permute.xlu1 %603 }
 0x58c   :  { %v606_v39 = vadd.f32 %v604_v38, %v183_v28 }
 0x58e   :  { %2790 = vtanh.f32 %v606_v39 }
 0x598   :  { %v2791_v40 = vpop.eup %2790 }
 0x599   :  { %v608_v41 = vsub.f32 %v542_v62, %v2791_v40 }
 0x59b   :  { %610 = vrot.lane.b32.xlu0 %v608_v41, %s2908_s19 }
 0x60d   :  { %v611_v42 = vpop.permute.xlu0 %610 }
 0x60e   :  { %v613_v43 = vmul.f32 %v2789_v34, %v611_v42 }
 0x610   :  { %615 = vrot.lane.b32.xlu1 %v613_v43, %s2907_s4 }
 0x682   :  { %v616_v44 = vpop.permute.xlu1 %615 }
 0x683   :  { %v618_v45 = vadd.f32 %v2791_v40, %v616_v44 }
 0x685   :  { %v619_v46 = vpack.c.bf16 %v618_v45, %v618_v45 }
 0x687   :  { %621 = vrot.lane.b32.xlu0 %v619_v46, %s2906_s1 }
 0x6f9   :  { %v3156_v47 = vpop.permute.xlu0 %621 }
 0x6fa   :  { %2567 = vmatmul.mubr.msk.bf16.vlgmr.msra.gmra.mrb[20].mxu0 %vm466_vm3, %v3156_v47 }
 0x6fb   :  { %2579 = vmatpush3.bf16.msra.mxu0 %v3051_v11  ;;  %2582 = vmatprep.mubr.msk.bf16.mxu0 %vm2905_vm1, %v2904_v1 }
 0x6fc   :  { %2580 = vmatprep.subr.bf16.mxu0 %v2904_v1 }
 0x6ff   :  { %2581 = vmatpush3.bf16.msra.mxu0 %v3058_v12 }
 0x700   :  { %2594 = vmatprep.subr.bf16.mxu0 %v2904_v1 }
 0x7cd   :  { %v660_v48 = vpop.f32.mrb[20].mxu0 }
 0x7ce   :  { %v661_v49 = vadd.f32 %v3084_v31, %v660_v48  ;;  %v2568_v50 = vpop.f32.mrb[21].mxu0 }
 0x7cf   :  { %v663_v51 = vpop.f32.mrb[22].mxu0 }
 0x7d0   :  { %674 = vrot.lane.b32.xlu1 %v661_v49, %s2906_s1  ;;  %v2569_v52 = vpop.f32.mrb[23].mxu0  ;;  %v666_v54 = vadd.f32 %v661_v49, %v227_v53 }
 0x7d2   :  { %v2351_v55 = vmul.f32 -1.442695, %v666_v54 }
 0x7d4   :  { %2792 = vpow2.f32 %v2351_v55 }
 0x7de   :  { %v2793_v56 = vpop.eup %2792 }
 0x7df   :  { %v670_v57 = vadd.f32 1.0, %v2793_v56 }
 0x7e1   :  { %2794 = vrcp.f32 %v670_v57 }
 0x7eb   :  { %v2795_v58 = vpop.eup %2794 }
 0x842   :  { %v675_v59 = vpop.permute.xlu1 %674 }
 0x843   :  { %v677_v60 = vmul.f32 %v2795_v58, %v675_v59 }
 0x845   :  { %679 = vrot.lane.b32.xlu0 %v677_v60, %s2906_s1 }
 0x8b7   :  { %v680_v61 = vpop.permute.xlu0 %679 }
 0x8b8   :  { %v682_v62 = vadd.f32 %v680_v61, %v227_v53 }
 0x8ba   :  { %2796 = vtanh.f32 %v682_v62 }
 0x8c4   :  { %v2797_v63 = vpop.eup %2796 }
 0x8c5   :  { %v684_v0 = vsub.f32 %v618_v45, %v2797_v63  ;;  %v315_v45 = vadd.f32 %v3091_v37, %v3077_v23 }
 0x8c7   :  { %686 = vrot.lane.b32.xlu1 %v684_v0, %s2908_s19 }
 0x939   :  { %v687_v2 = vpop.permute.xlu1 %686 }
 0x93a   :  { %v689_v19 = vmul.f32 %v2795_v58, %v687_v2 }
 0x93c   :  { %691 = vrot.lane.b32.xlu0 %v689_v19, %s2907_s4 }
 0x9ae   :  { %v692_v3 = vpop.permute.xlu0 %691 }
 0x9af   :  { %v694_v4 = vadd.f32 %v2797_v63, %v692_v3 }
 0x9b1   :  { %v695_v6 = vpack.c.bf16 %v694_v4, %v694_v4 }
 0x9b3   :  { %697 = vrot.lane.b32.xlu1 %v695_v6, %s2906_s1 }
 0xa25   :  { %v3174_v7 = vpop.permute.xlu1 %697 }
 0xa26   :  { %2575 = vmatmul.mubr.msk.bf16.vlgmr.msra.gmra.mrb[20].mxu1 %vm466_vm3, %v3174_v7 }
 0xa27   :  { %2587 = vmatpush3.bf16.msra.mxu1 %v3051_v11  ;;  %2590 = vmatprep.mubr.msk.bf16.mxu1 %vm2905_vm1, %v2904_v1 }
 0xa28   :  { %2588 = vmatprep.subr.bf16.mxu1 %v2904_v1 }
 0xa2b   :  { %2589 = vmatpush3.bf16.msra.mxu1 %v3058_v12 }
 0xa2c   :  { %2602 = vmatprep.subr.bf16.mxu1 %v2904_v1 }
 0xaf9   :  { %v736_v8 = vpop.f32.mrb[20].mxu1 }
 0xafa   :  { %v737_v10 = vadd.f32 %v3084_v31, %v736_v8  ;;  %v2576_v13 = vpop.f32.mrb[21].mxu1 }
 0xafb   :  { %v739_v14 = vpop.f32.mrb[22].mxu1 }
 0xafc   :  { %750 = vrot.lane.b32.xlu0 %v737_v10, %s2906_s1  ;;  %v2577_v16 = vpop.f32.mrb[23].mxu1  ;;  %v742_v18 = vadd.f32 %v737_v10, %v271_v17 }
 0xafe   :  { %v2353_v21 = vmul.f32 -1.442695, %v742_v18 }
 0xb00   :  { %2798 = vpow2.f32 %v2353_v21 }
 0xb0a   :  { %v2799_v22 = vpop.eup %2798 }
 0xb0b   :  { %v746_v24 = vadd.f32 1.0, %v2799_v22 }
 0xb0d   :  { %2800 = vrcp.f32 %v746_v24 }
 0xb17   :  { %v2801_v25 = vpop.eup %2800 }
 0xb6e   :  { %v751_v26 = vpop.permute.xlu0 %750 }
 0xb6f   :  { %v753_v28 = vmul.f32 %v2801_v25, %v751_v26 }
 0xb71   :  { %755 = vrot.lane.b32.xlu1 %v753_v28, %s2906_s1  ;;  %v3232_v28 = vld [vmem:[%s3555_s6] sm:$0xff]  }
 0xbe3   :  { %v756_v29 = vpop.permute.xlu1 %755 }
 0xbe4   :  { %v758_v30 = vadd.f32 %v756_v29, %v271_v17 }
 0xbe6   :  { %2802 = vtanh.f32 %v758_v30  ;;  %v3242_v30 = vld [vmem:[%s3555_s6 + $0x8] sm:$0xff]  }
 0xbf0   :  { %v2803_v32 = vpop.eup %2802 }
 0xbf1   :  { %v760_v33 = vsub.f32 %v694_v4, %v2803_v32 }
 0xbf3   :  { %762 = vrot.lane.b32.xlu0 %v760_v33, %s2908_s19 }
 0xc65   :  { %v763_v34 = vpop.permute.xlu0 %762 }
 0xc66   :  { %v765_v5 = vmul.f32 %v2801_v25, %v763_v34 }
 0xc68   :  { %767 = vrot.lane.b32.xlu1 %v765_v5, %s2907_s4 }
 0xcda   :  { %v768_v35 = vpop.permute.xlu1 %767 }
 0xcdb   :  { %v770_v36 = vadd.f32 %v2803_v32, %v768_v35 }
 0xcdd   :  { %v771_v38 = vpack.c.bf16 %v770_v36, %v770_v36 }
 0xcdf   :  { %773 = vrot.lane.b32.xlu0 %v771_v38, %s2906_s1 }
 0xd51   :  { %v3192_v39 = vpop.permute.xlu0 %773 }
 0xd52   :  { %2583 = vmatmul.mubr.msk.bf16.vlgmr.msra.gmra.mrb[24].mxu0 %vm466_vm3, %v3192_v39 }
 0xd53   :  { %2595 = vmatpush3.bf16.msra.mxu0 %v3051_v11  ;;  %2598 = vmatprep.mubr.msk.bf16.mxu0 %vm2905_vm1, %v2904_v1 }
 0xd54   :  { %2596 = vmatprep.subr.bf16.mxu0 %v2904_v1 }
 0xd57   :  { %2597 = vmatpush3.bf16.msra.mxu0 %v3058_v12 }
 0xd58   :  { %2610 = vmatprep.subr.bf16.mxu0 %v2904_v1 }
 0xe25   :  { %v812_v40 = vpop.f32.mrb[24].mxu0 }
 0xe26   :  { %v813_v41 = vadd.f32 %v3084_v31, %v812_v40  ;;  %v2584_v42 = vpop.f32.mrb[25].mxu0 }
 0xe27   :  { %v815_v43 = vpop.f32.mrb[26].mxu0 }
 0xe28   :  { %826 = vrot.lane.b32.xlu1 %v813_v41, %s2906_s1  ;;  %v2585_v44 = vpop.f32.mrb[27].mxu0  ;;  %v818_v46 = vadd.f32 %v813_v41, %v315_v45 }
 0xe2a   :  { %v2355_v48 = vmul.f32 -1.442695, %v818_v46 }
 0xe2c   :  { %2804 = vpow2.f32 %v2355_v48 }
 0xe36   :  { %v2805_v49 = vpop.eup %2804 }
 0xe37   :  { %v822_v50 = vadd.f32 1.0, %v2805_v49  ;;  %v403_v49 = vadd.f32 %v3091_v37, %v3079_v27 }
 0xe39   :  { %2806 = vrcp.f32 %v822_v50 }
 0xe43   :  { %v2807_v51 = vpop.eup %2806 }
 0xe9a   :  { %v827_v52 = vpop.permute.xlu1 %826 }
 0xe9b   :  { %v829_v53 = vmul.f32 %v2807_v51, %v827_v52 }
 0xe9d   :  { %831 = vrot.lane.b32.xlu0 %v829_v53, %s2906_s1 }
 0xf0f   :  { %v832_v54 = vpop.permute.xlu0 %831 }
 0xf10   :  { %v834_v55 = vadd.f32 %v832_v54, %v315_v45 }
 0xf12   :  { %2808 = vtanh.f32 %v834_v55 }
 0xf1c   :  { %v2809_v56 = vpop.eup %2808 }
 0xf1d   :  { %v836_v57 = vsub.f32 %v770_v36, %v2809_v56 }
 0xf1f   :  { %838 = vrot.lane.b32.xlu1 %v836_v57, %s2908_s19 }
 0xf91   :  { %v839_v58 = vpop.permute.xlu1 %838 }
 0xf92   :  { %v841_v23 = vmul.f32 %v2807_v51, %v839_v58 }
 0xf94   :  { %843 = vrot.lane.b32.xlu0 %v841_v23, %s2907_s4 }
0x1006   :  { %v844_v59 = vpop.permute.xlu0 %843 }
0x1007   :  { %v846_v60 = vadd.f32 %v2809_v56, %v844_v59 }
0x1009   :  { %v847_v61 = vpack.c.bf16 %v846_v60, %v846_v60 }
0x100b   :  { %849 = vrot.lane.b32.xlu1 %v847_v61, %s2906_s1 }
0x107d   :  { %v850_v62 = vpop.permute.xlu1 %849 }
0x107e   :  { %2591 = vmatmul.mubr.msk.bf16.vlgmr.msra.gmra.mrb[24].mxu1 %vm466_vm3, %v850_v62 }
0x107f   :  { %2603 = vmatpush3.bf16.msra.mxu1 %v3051_v11  ;;  %2606 = vmatprep.mubr.msk.bf16.mxu1 %vm2905_vm1, %v2904_v1  ;;  %v359_v11 = vadd.f32 %v3091_v37, %v3135_v9 }
0x1080   :  { %2604 = vmatprep.subr.bf16.mxu1 %v2904_v1 }
0x1083   :  { %2605 = vmatpush3.bf16.msra.mxu1 %v3058_v12 }
0x1084   :  { %2618 = vmatprep.subr.bf16.mxu1 %v2904_v1 }
0x1151   :  { %v888_v63 = vpop.f32.mrb[24].mxu1 }
0x1152   :  { %v889_v0 = vadd.f32 %v3084_v31, %v888_v63  ;;  %v2592_v2 = vpop.f32.mrb[25].mxu1 }
0x1153   :  { %v891_v19 = vpop.f32.mrb[26].mxu1 }
0x1154   :  { %902 = vrot.lane.b32.xlu0 %v889_v0, %s2906_s1  ;;  %v2593_v3 = vpop.f32.mrb[27].mxu1  ;;  %v894_v4 = vadd.f32 %v889_v0, %v359_v11  ;;  %v3294_v0 = vld [vmem:[%s3556_s7] sm:$0xff]   ;;  %v3303_v19 = vld [vmem:[%s3556_s7 + $0x8] sm:$0xff]  }
0x1155   :  { %v3308_v3 = vld [vmem:[%s3575_s30 + $0x2] sm:$0x3] }
0x1156   :  { %v2357_v6 = vmul.f32 -1.442695, %v894_v4 }
0x1158   :  { %2810 = vpow2.f32 %v2357_v6 }
0x1162   :  { %v2811_v8 = vpop.eup %2810 }
0x1163   :  { %v898_v10 = vadd.f32 1.0, %v2811_v8 }
0x1165   :  { %2812 = vrcp.f32 %v898_v10 }
0x116f   :  { %v2813_v12 = vpop.eup %2812 }
0x11c6   :  { %v903_v13 = vpop.permute.xlu0 %902 }
0x11c7   :  { %v905_v14 = vmul.f32 %v2813_v12, %v903_v13 }
0x11c9   :  { %907 = vrot.lane.b32.xlu1 %v905_v14, %s2906_s1 }
0x123b   :  { %v908_v16 = vpop.permute.xlu1 %907 }
0x123c   :  { %v910_v17 = vadd.f32 %v908_v16, %v359_v11  ;;  %v1438_v11 = vpack.c.bf16 %v3308_v3, %v3308_v3  ;;  %v3360_v16 = vld [vmem:[%s3558_s9] ss:$0 sm:$0xff] }
0x123e   :  { %2814 = vtanh.f32 %v910_v17 }
0x1248   :  { %v2815_v18 = vpop.eup %2814 }
0x1249   :  { %v912_v21 = vsub.f32 %v846_v60, %v2815_v18 }
0x124b   :  { %914 = vrot.lane.b32.xlu0 %v912_v21, %s2908_s19 }
0x12bd   :  { %v915_v22 = vpop.permute.xlu0 %914 }
0x12be   :  { %v917_v9 = vmul.f32 %v2813_v12, %v915_v22 }
0x12c0   :  { %919 = vrot.lane.b32.xlu1 %v917_v9, %s2907_s4 }
0x1332   :  { %v920_v24 = vpop.permute.xlu1 %919 }
0x1333   :  { %v3224_v25 = vadd.f32 %v2815_v18, %v920_v24 }
0x1335   :  { %v923_v26 = vpack.c.bf16 %v3224_v25, %v3224_v25 }
0x1337   :  { %925 = vrot.lane.b32.xlu0 %v923_v26, %s2906_s1 }
0x13a9   :  { %v3234_v29 = vpop.permute.xlu0 %925 }
0x13aa   :  { %2599 = vmatmul.mubr.msk.bf16.vlgmr.msra.gmra.mrb[28].mxu0 %vm466_vm3, %v3234_v29 }
0x13ab   :  { %2611 = vmatpush3.bf16.msra.mxu0 %v3232_v28  ;;  %2614 = vmatprep.mubr.msk.bf16.mxu0 %vm2905_vm1, %v2904_v1 }
0x13ac   :  { %2612 = vmatprep.subr.bf16.mxu0 %v2904_v1 }
0x13af   :  { %2613 = vmatpush3.bf16.msra.mxu0 %v3242_v30 }
0x13b0   :  { %2626 = vmatprep.subr.bf16.mxu0 %v2904_v1 }
0x13b2   :  { %2615 = vmatmul.mubr.msk.bf16.vlgmr.msra.gmra.mrb[32].mxu0 %vm466_vm3, %v3139_v20 }
0x13b3   :  { %2627 = vmatpush3.bf16.msra.mxu0 %v3232_v28  ;;  %2630 = vmatprep.mubr.msk.bf16.mxu0 %vm2905_vm1, %v2904_v1 }
0x13b4   :  { %2628 = vmatprep.subr.bf16.mxu0 %v2904_v1 }
0x13b7   :  { %2629 = vmatpush3.bf16.msra.mxu0 %v3242_v30 }
0x13b8   :  { %2642 = vmatprep.subr.bf16.mxu0 %v2904_v1 }
0x13ba   :  { %2631 = vmatmul.mubr.msk.bf16.vlgmr.msra.gmra.mrb[36].mxu0 %vm466_vm3, %v3174_v7 }
0x13bb   :  { %2643 = vmatpush3.bf16.msra.mxu0 %v3232_v28  ;;  %2646 = vmatprep.mubr.msk.bf16.mxu0 %vm2905_vm1, %v2904_v1 }
0x13bc   :  { %2644 = vmatprep.subr.bf16.mxu0 %v2904_v1 }
0x13bf   :  { %2645 = vmatpush3.bf16.msra.mxu0 %v3242_v30 }
0x13c0   :  { %2658 = vmatprep.subr.bf16.mxu0 %v2904_v1 }
0x13c2   :  { %2647 = vmatmul.mubr.msk.bf16.vlgmr.msra.gmra.mrb[40].mxu0 %vm466_vm3, %v850_v62 }
0x13c3   :  { %2659 = vmatpush3.bf16.msra.mxu0 %v3232_v28  ;;  %2662 = vmatprep.mubr.msk.bf16.mxu0 %vm2905_vm1, %v2904_v1 }
0x13c4   :  { %2660 = vmatprep.subr.bf16.mxu0 %v2904_v1 }
0x13c7   :  { %2661 = vmatpush3.bf16.msra.mxu0 %v3242_v30 }
0x13c8   :  { %2674 = vmatprep.subr.bf16.mxu0 %v2904_v1 }
0x147d   :  { %v964_v20 = vpop.f32.mrb[28].mxu0 }
0x147e   :  { %v965_v7 = vadd.f32 %v3084_v31, %v964_v20  ;;  %v2600_v32 = vpop.f32.mrb[29].mxu0 }
0x147f   :  { %v967_v33 = vpop.f32.mrb[30].mxu0 }
0x1480   :  { %978 = vrot.lane.b32.xlu1 %v965_v7, %s2906_s1  ;;  %v2601_v34 = vpop.f32.mrb[31].mxu0  ;;  %v970_v50 = vadd.f32 %v965_v7, %v403_v49 }
0x1482   :  { %v2359_v51 = vmul.f32 -1.442695, %v970_v50 }
0x1484   :  { %2816 = vpow2.f32 %v2359_v51 }
0x1485   :  { %v3274_v5 = vpop.f32.mrb[32].mxu0 }
0x1486   :  { %v2616_v35 = vpop.f32.mrb[33].mxu0 }
0x1487   :  { %v1146_v36 = vpop.f32.mrb[34].mxu0  ;;  %v447_v35 = vadd.f32 %v3091_v37, %v3137_v15 }
0x1488   :  { %v2617_v38 = vpop.f32.mrb[35].mxu0 }
0x1489   :  { %v3375_v38 = vld [vmem:[%s3557_s8] ss:$0 sm:$0xff]  ;;  %s2319_s8 = sshll.u32 %s2910_s23, 4  ;;  %s2320_s8 = int_to_ptr.vmem [resolvable:$true] %s2319_s8 }
0x148a   :  { %p2885_p1 = scmp.lt.s32.totalorder %s2320_s8, %s2320_s8 }
0x148d   :  { %v3276_v40 = vpop.f32.mrb[36].mxu0 }
0x148e   :  { %v2632_v41 = vpop.f32.mrb[37].mxu0  ;;  %v2817_v52 = vpop.eup %2816 }
0x148f   :  { %v1226_v42 = vpop.f32.mrb[38].mxu0  ;;  %v974_v53 = vadd.f32 1.0, %v2817_v52 }
0x1490   :  { %v2633_v43 = vpop.f32.mrb[39].mxu0  ;;  %v1144_v42 = vadd.f32 %v3375_v38, %v3274_v5 }
0x1491   :  { %2818 = vrcp.f32 %v974_v53 }
0x1495   :  { %v3278_v44 = vpop.f32.mrb[40].mxu0 }
0x1496   :  { %v2648_v45 = vpop.f32.mrb[41].mxu0 }
0x1497   :  { %v1306_v46 = vpop.f32.mrb[42].mxu0 }
0x1498   :  { %v2649_v48 = vpop.f32.mrb[43].mxu0 }
0x149b   :  { %v2819_v54 = vpop.eup %2818 }
0x14f2   :  { %v979_v55 = vpop.permute.xlu1 %978 }
0x14f3   :  { %v981_v56 = vmul.f32 %v2819_v54, %v979_v55 }
0x14f5   :  { %983 = vrot.lane.b32.xlu0 %v981_v56, %s2906_s1 }
0x1567   :  { %v984_v57 = vpop.permute.xlu0 %983 }
0x1568   :  { %v986_v58 = vadd.f32 %v984_v57, %v403_v49 }
0x156a   :  { %2820 = vtanh.f32 %v986_v58 }
0x1574   :  { %v2821_v23 = vpop.eup %2820 }
0x1575   :  { %v988_v59 = vsub.f32 %v3224_v25, %v2821_v23 }
0x1577   :  { %990 = vrot.lane.b32.xlu1 %v988_v59, %s2908_s19 }
0x15e9   :  { %v991_v27 = vpop.permute.xlu1 %990 }
0x15ea   :  { %v993_v60 = vmul.f32 %v2819_v54, %v991_v27 }
0x15ec   :  { %995 = vrot.lane.b32.xlu0 %v993_v60, %s2907_s4 }
0x165e   :  { %v996_v61 = vpop.permute.xlu0 %995 }
0x165f   :  { %v3286_v62 = vadd.f32 %v2821_v23, %v996_v61 }
0x1661   :  { %v999_v63 = vpack.c.bf16 %v3286_v62, %v3286_v62 }
0x1663   :  { %1001 = vrot.lane.b32.xlu1 %v999_v63, %s2906_s1 }
0x16d5   :  { %v1002_v2 = vpop.permute.xlu1 %1001 }
0x16d6   :  { %2607 = vmatmul.mubr.msk.bf16.vlgmr.msra.gmra.mrb[28].mxu1 %vm466_vm3, %v1002_v2  ;;  %2663 = vmatmul.mubr.msk.bf16.vlgmr.msra.gmra.mrb[44].mxu0 %vm466_vm3, %v1002_v2 }
0x16d7   :  { %2619 = vmatpush3.bf16.msra.mxu1 %v3232_v28  ;;  %2675 = vmatpush3.bf16.msra.mxu0 %v3294_v0 }
0x16d8   :  { %2620 = vmatprep.subr.bf16.mxu1 %v2904_v1  ;;  %2676 = vmatprep.subr.bf16.mxu0 %v2904_v1 }
0x16d9   :  { %2622 = vmatprep.mubr.msk.bf16.mxu1 %vm2905_vm1, %v2904_v1  ;;  %2678 = vmatprep.mubr.msk.bf16.mxu0 %vm2905_vm1, %v2904_v1 }
0x16db   :  { %2621 = vmatpush3.bf16.msra.mxu1 %v3242_v30  ;;  %2677 = vmatpush3.bf16.msra.mxu0 %v3303_v19 }
0x16dc   :  { %2634 = vmatprep.subr.bf16.mxu1 %v2904_v1  ;;  %2690 = vmatprep.subr.bf16.mxu0 %v2904_v1 }
0x16de   :  { %2623 = vmatmul.mubr.msk.bf16.vlgmr.msra.gmra.mrb[32].mxu1 %vm466_vm3, %v3156_v47  ;;  %2679 = vmatmul.mubr.msk.bf16.vlgmr.msra.gmra.mrb[48].mxu0 %vm466_vm3, %v1438_v11 }
0x16df   :  { %2635 = vmatpush3.bf16.msra.mxu1 %v3232_v28  ;;  %2638 = vmatprep.mubr.msk.bf16.mxu1 %vm2905_vm1, %v2904_v1 }
0x16e0   :  { %2636 = vmatprep.subr.bf16.mxu1 %v2904_v1  ;;  %2691 = vmatpush3.bf16.msra.mxu0 %v3294_v0 }
0x16e1   :  { %2692 = vmatprep.subr.bf16.mxu0 %v2904_v1  ;;  %2694 = vmatprep.mubr.msk.bf16.mxu0 %vm2905_vm1, %v2904_v1 }
0x16e3   :  { %2637 = vmatpush3.bf16.msra.mxu1 %v3242_v30 }
0x16e4   :  { %2650 = vmatprep.subr.bf16.mxu1 %v2904_v1  ;;  %2693 = vmatpush3.bf16.msra.mxu0 %v3303_v19 }
0x16e5   :  { %2706 = vmatprep.subr.bf16.mxu0 %v2904_v1 }
0x16e6   :  { %2639 = vmatmul.mubr.msk.bf16.vlgmr.msra.gmra.mrb[36].mxu1 %vm466_vm3, %v3192_v39 }
0x16e7   :  { %2651 = vmatpush3.bf16.msra.mxu1 %v3232_v28  ;;  %2654 = vmatprep.mubr.msk.bf16.mxu1 %vm2905_vm1, %v2904_v1 }
0x16e8   :  { %2652 = vmatprep.subr.bf16.mxu1 %v2904_v1 }
0x16eb   :  { %2653 = vmatpush3.bf16.msra.mxu1 %v3242_v30 }
0x16ec   :  { %2666 = vmatprep.subr.bf16.mxu1 %v2904_v1 }
0x16ee   :  { %2655 = vmatmul.mubr.msk.bf16.vlgmr.msra.gmra.mrb[40].mxu1 %vm466_vm3, %v3234_v29 }
0x16ef   :  { %2667 = vmatpush3.bf16.msra.mxu1 %v3232_v28  ;;  %2670 = vmatprep.mubr.msk.bf16.mxu1 %vm2905_vm1, %v2904_v1 }
0x16f0   :  { %2668 = vmatprep.subr.bf16.mxu1 %v2904_v1 }
0x16f3   :  { %2669 = vmatpush3.bf16.msra.mxu1 %v3242_v30 }
0x16f4   :  { %2682 = vmatprep.subr.bf16.mxu1 %v2904_v1 }
0x17a9   :  { %v1040_v47 = vpop.f32.mrb[28].mxu1  ;;  %v3353_v39 = vpop.f32.mrb[44].mxu0 }
0x17aa   :  { %v1041_v4 = vadd.f32 %v3084_v31, %v1040_v47  ;;  %v2608_v6 = vpop.f32.mrb[29].mxu1  ;;  %v2664_v8 = vpop.f32.mrb[45].mxu0 }
0x17ab   :  { %v1043_v10 = vpop.f32.mrb[30].mxu1  ;;  %v1386_v12 = vpop.f32.mrb[46].mxu0 }
0x17ac   :  { %1054 = vrot.lane.b32.xlu1 %v1041_v4, %s2906_s1  ;;  %v2609_v13 = vpop.f32.mrb[31].mxu1  ;;  %v2665_v14 = vpop.f32.mrb[47].mxu0  ;;  %v1046_v36 = vadd.f32 %v1041_v4, %v447_v35 }
0x17ae   :  { %v2361_v41 = vmul.f32 -1.442695, %v1046_v36 }
0x17b0   :  { %2822 = vpow2.f32 %v2361_v41 }
0x17b1   :  { %v3362_v17 = vpop.f32.mrb[32].mxu1  ;;  %v1488_v18 = vpop.f32.mrb[48].mxu0 }
0x17b2   :  { %v1489_v21 = vadd.f32 %v3360_v16, %v1488_v18  ;;  %v2624_v22 = vpop.f32.mrb[33].mxu1  ;;  %v2680_v31 = vpop.f32.mrb[49].mxu0 }
0x17b3   :  { %v1186_v9 = vpop.f32.mrb[34].mxu1  ;;  %v1491_v24 = vpop.f32.mrb[50].mxu0 }
0x17b4   :  { %v2625_v25 = vpop.f32.mrb[35].mxu1  ;;  %1502 = vrot.lane.b32.xlu0 %v1489_v21, %s2906_s1  ;;  %v2681_v26 = vpop.f32.mrb[51].mxu0  ;;  %v1494_v43 = vadd.f32 %v1489_v21, %v1144_v42 }
0x17b5   :  { %v1184_v26 = vadd.f32 %v3375_v38, %v3362_v17 }
0x17b6   :  { %v2378_v45 = vmul.f32 -1.442695, %v1494_v43 }
0x17b8   :  { %2824 = vpow2.f32 %v2378_v45 }
0x17b9   :  { %v3366_v28 = vpop.f32.mrb[36].mxu1 }
0x17ba   :  { %v2640_v29 = vpop.f32.mrb[37].mxu1  ;;  %v2823_v46 = vpop.eup %2822 }
0x17bb   :  { %v1266_v30 = vpop.f32.mrb[38].mxu1  ;;  %v1050_v48 = vadd.f32 1.0, %v2823_v46 }
0x17bc   :  { %v2641_v20 = vpop.f32.mrb[39].mxu1 }
0x17bd   :  { %2826 = vrcp.f32 %v1050_v48 }
0x17c1   :  { %v3368_v7 = vpop.f32.mrb[40].mxu1 }
0x17c2   :  { %v2656_v32 = vpop.f32.mrb[41].mxu1  ;;  %v2825_v49 = vpop.eup %2824 }
0x17c3   :  { %v1346_v33 = vpop.f32.mrb[42].mxu1  ;;  %v1498_v50 = vadd.f32 1.0, %v2825_v49 }
0x17c4   :  { %v2657_v34 = vpop.f32.mrb[43].mxu1 }
0x17c5   :  { %2828 = vrcp.f32 %v1498_v50 }
0x17c7   :  { %v2827_v37 = vpop.eup %2826 }
0x17cf   :  { %v2829_v52 = vpop.eup %2828 }
0x181e   :  { %v1055_v15 = vpop.permute.xlu1 %1054 }
0x181f   :  { %v1057_v51 = vmul.f32 %v2827_v37, %v1055_v15 }
0x1821   :  { %1059 = vrot.lane.b32.xlu1 %v1057_v51, %s2906_s1 }
0x1826   :  { %v1503_v53 = vpop.permute.xlu0 %1502 }
0x1827   :  { %v1505_v54 = vmul.f32 %v2829_v52, %v1503_v53 }
0x1829   :  { %1507 = vrot.lane.b32.xlu0 %v1505_v54, %s2906_s1  ;;  %v1224_v54 = vadd.f32 %v3375_v38, %v3276_v40 }
0x1893   :  { %v1060_v5 = vpop.permute.xlu1 %1059 }
0x1894   :  { %v1062_v55 = vadd.f32 %v1060_v5, %v447_v35 }
0x1896   :  { %2830 = vtanh.f32 %v1062_v55 }
0x189b   :  { %v1508_v56 = vpop.permute.xlu0 %1507 }
0x189c   :  { %v1510_v57 = vadd.f32 %v1508_v56, %v1144_v42 }
0x189e   :  { %2832 = vtanh.f32 %v1510_v57 }
0x18a0   :  { %v2831_v58 = vpop.eup %2830 }
0x18a1   :  { %v1064_v23 = vsub.f32 %v3286_v62, %v2831_v58 }
0x18a3   :  { %1066 = vrot.lane.b32.xlu1 %v1064_v23, %s2908_s19 }
0x18a8   :  { %v2833_v59 = vpop.eup %2832 }
0x18a9   :  { %1513 = vrot.lane.b32.xlu0 %v2833_v59, %s2906_s1 }
0x1915   :  { %v1067_v27 = vpop.permute.xlu1 %1066 }
0x1916   :  { %v1069_v60 = vmul.f32 %v2827_v37, %v1067_v27 }
0x1918   :  { %1071 = vrot.lane.b32.xlu1 %v1069_v60, %s2907_s4 }
0x191b   :  { %v1514_v61 = vpop.permute.xlu0 %1513 }
0x191c   :  { %v1516_v63 = vsub.f32 %v3308_v3, %v1514_v61 }
0x191e   :  { %1518 = vrot.lane.b32.xlu0 %v1516_v63, %s2907_s4 }
0x198a   :  { %v1072_v2 = vpop.permute.xlu1 %1071 }
0x198b   :  { %v1074_v11 = vadd.f32 %v2831_v58, %v1072_v2 }
0x198d   :  { %v1389_v47 = vpack.c.bf16 %v1074_v11, %v1074_v11 }
0x198f   :  { %1391 = vrot.lane.b32.xlu1 %v1389_v47, %s2906_s1 }
0x1990   :  { %v1519_v62 = vpop.permute.xlu0 %1518 }
0x1991   :  { %v1521_v4 = vmul.f32 %v2829_v52, %v1519_v62 }
0x1993   :  { %1523 = vrot.lane.b32.xlu0 %v1521_v4, %s2907_s4 }
0x1a01   :  { %v1392_v6 = vpop.permute.xlu1 %1391 }
0x1a02   :  { %2671 = vmatmul.mubr.msk.bf16.vlgmr.msra.gmra.mrb[44].mxu1 %vm466_vm3, %v1392_v6 }
0x1a03   :  { %2683 = vmatpush3.bf16.msra.mxu1 %v3294_v0  ;;  %2686 = vmatprep.mubr.msk.bf16.mxu1 %vm2905_vm1, %v2904_v1 }
0x1a04   :  { %2684 = vmatprep.subr.bf16.mxu1 %v2904_v1 }
0x1a05   :  { %v1524_v3 = vpop.permute.xlu0 %1523 }
0x1a06   :  { %v1526_v8 = vadd.f32 %v2833_v59, %v1524_v3 }
0x1a07   :  { %2685 = vmatpush3.bf16.msra.mxu1 %v3303_v19 }
0x1a08   :  { %v1527_v10 = vpack.c.bf16 %v1526_v8, %v1526_v8  ;;  %2698 = vmatprep.subr.bf16.mxu1 %v2904_v1 }
0x1a0a   :  { %1529 = vrot.lane.b32.xlu0 %v1527_v10, %s2906_s1 }
0x1a7c   :  { %v1530_v12 = vpop.permute.xlu0 %1529 }
0x1a7d   :  { %2687 = vmatmul.mubr.msk.bf16.vlgmr.msra.gmra.mrb[48].mxu1 %vm466_vm3, %v1530_v12 }
0x1a7e   :  { %2699 = vmatpush3.bf16.msra.mxu1 %v3294_v0  ;;  %2702 = vmatprep.mubr.msk.bf16.mxu1 %vm2905_vm1, %v2904_v1 }
0x1a7f   :  { %2700 = vmatprep.subr.bf16.mxu1 %v2904_v1 }
0x1a82   :  { %2701 = vmatpush3.bf16.msra.mxu1 %v3303_v19 }
0x1a83   :  { %2714 = vmatprep.subr.bf16.mxu1 %v2904_v1 }
0x1ad5   :  { %v3404_v13 = vpop.f32.mrb[44].mxu1 }
0x1ad6   :  { %v2672_v14 = vpop.f32.mrb[45].mxu1 }
0x1ad7   :  { %v1433_v18 = vpop.f32.mrb[46].mxu1  ;;  %v1264_v14 = vadd.f32 %v3375_v38, %v3366_v28 }
0x1ad8   :  { %v2673_v21 = vpop.f32.mrb[47].mxu1 }
0x1b50   :  { %v1568_v22 = vpop.f32.mrb[48].mxu1 }
0x1b51   :  { %v1569_v31 = vadd.f32 %v3360_v16, %v1568_v22  ;;  %v2688_v9 = vpop.f32.mrb[49].mxu1 }
0x1b52   :  { %v1571_v24 = vpop.f32.mrb[50].mxu1 }
0x1b53   :  { %1582 = vrot.lane.b32.xlu1 %v1569_v31, %s2906_s1  ;;  %v2689_v25 = vpop.f32.mrb[51].mxu1  ;;  %v1574_v29 = vadd.f32 %v1569_v31, %v1184_v26 }
0x1b55   :  { %v2380_v30 = vmul.f32 -1.442695, %v1574_v29 }
0x1b57   :  { %2834 = vpow2.f32 %v2380_v30 }
0x1b61   :  { %v2835_v20 = vpop.eup %2834 }
0x1b62   :  { %v1578_v32 = vadd.f32 1.0, %v2835_v20 }
0x1b64   :  { %2836 = vrcp.f32 %v1578_v32 }
0x1b6e   :  { %v2837_v33 = vpop.eup %2836 }
0x1bc5   :  { %v1583_v34 = vpop.permute.xlu1 %1582 }
0x1bc6   :  { %v1585_v35 = vmul.f32 %v2837_v33, %v1583_v34 }
0x1bc8   :  { %1587 = vrot.lane.b32.xlu0 %v1585_v35, %s2906_s1 }
0x1c3a   :  { %v1588_v36 = vpop.permute.xlu0 %1587 }
0x1c3b   :  { %v1590_v41 = vadd.f32 %v1588_v36, %v1184_v26 }
0x1c3d   :  { %2838 = vtanh.f32 %v1590_v41 }
0x1c47   :  { %v2839_v42 = vpop.eup %2838 }
0x1c48   :  { %v1592_v43 = vsub.f32 %v1526_v8, %v2839_v42 }
0x1c4a   :  { %1594 = vrot.lane.b32.xlu1 %v1592_v43, %s2908_s19 }
0x1cbc   :  { %v1595_v45 = vpop.permute.xlu1 %1594 }
0x1cbd   :  { %v1597_v17 = vmul.f32 %v2837_v33, %v1595_v45 }
0x1cbf   :  { %1599 = vrot.lane.b32.xlu0 %v1597_v17, %s2907_s4 }
0x1d31   :  { %v1600_v46 = vpop.permute.xlu0 %1599 }
0x1d32   :  { %v1602_v48 = vadd.f32 %v2839_v42, %v1600_v46  ;;  %v1304_v46 = vadd.f32 %v3375_v38, %v3278_v44 }
0x1d34   :  { %v1603_v49 = vpack.c.bf16 %v1602_v48, %v1602_v48 }
0x1d36   :  { %1605 = vrot.lane.b32.xlu1 %v1603_v49, %s2906_s1 }
0x1da8   :  { %v1606_v50 = vpop.permute.xlu1 %1605 }
0x1da9   :  { %2695 = vmatmul.mubr.msk.bf16.vlgmr.msra.gmra.mrb[52].mxu0 %vm466_vm3, %v1606_v50 }
0x1daa   :  { %2707 = vmatpush3.bf16.msra.mxu0 %v3294_v0  ;;  %2710 = vmatprep.mubr.msk.bf16.mxu0 %vm2905_vm1, %v2904_v1 }
0x1dab   :  { %2708 = vmatprep.subr.bf16.mxu0 %v2904_v1 }
0x1dae   :  { %2709 = vmatpush3.bf16.msra.mxu0 %v3303_v19 }
0x1daf   :  { %2722 = vmatprep.subr.bf16.mxu0 %v2904_v1 }
0x1e7c   :  { %v1644_v37 = vpop.f32.mrb[52].mxu0 }
0x1e7d   :  { %v1645_v15 = vadd.f32 %v3360_v16, %v1644_v37  ;;  %v2696_v51 = vpop.f32.mrb[53].mxu0 }
0x1e7e   :  { %v1647_v52 = vpop.f32.mrb[54].mxu0 }
0x1e7f   :  { %1658 = vrot.lane.b32.xlu0 %v1645_v15, %s2906_s1  ;;  %v2697_v53 = vpop.f32.mrb[55].mxu0  ;;  %v1650_v5 = vadd.f32 %v1645_v15, %v1224_v54 }
0x1e81   :  { %v2382_v55 = vmul.f32 -1.442695, %v1650_v5 }
0x1e83   :  { %2840 = vpow2.f32 %v2382_v55 }
0x1e8d   :  { %v2841_v56 = vpop.eup %2840 }
0x1e8e   :  { %v1654_v57 = vadd.f32 1.0, %v2841_v56 }
0x1e90   :  { %2842 = vrcp.f32 %v1654_v57 }
0x1e9a   :  { %v2843_v58 = vpop.eup %2842 }
0x1ef1   :  { %v1659_v23 = vpop.permute.xlu0 %1658 }
0x1ef2   :  { %v1661_v59 = vmul.f32 %v2843_v58, %v1659_v23 }
0x1ef4   :  { %1663 = vrot.lane.b32.xlu1 %v1661_v59, %s2906_s1 }
0x1f66   :  { %v1664_v27 = vpop.permute.xlu1 %1663 }
0x1f67   :  { %v1666_v60 = vadd.f32 %v1664_v27, %v1224_v54 }
0x1f69   :  { %2844 = vtanh.f32 %v1666_v60 }
0x1f73   :  { %v2845_v61 = vpop.eup %2844 }
0x1f74   :  { %v1668_v63 = vsub.f32 %v1602_v48, %v2845_v61 }
0x1f76   :  { %1670 = vrot.lane.b32.xlu0 %v1668_v63, %s2908_s19 }
0x1fe8   :  { %v1671_v2 = vpop.permute.xlu0 %1670 }
0x1fe9   :  { %v1673_v40 = vmul.f32 %v2843_v58, %v1671_v2 }
0x1feb   :  { %1675 = vrot.lane.b32.xlu1 %v1673_v40, %s2907_s4  ;;  %v1344_v40 = vadd.f32 %v3375_v38, %v3368_v7 }
0x205d   :  { %v1676_v11 = vpop.permute.xlu1 %1675 }
0x205e   :  { %v1678_v47 = vadd.f32 %v2845_v61, %v1676_v11 }
0x2060   :  { %v1679_v62 = vpack.c.bf16 %v1678_v47, %v1678_v47 }
0x2062   :  { %1681 = vrot.lane.b32.xlu0 %v1679_v62, %s2906_s1 }
0x20d4   :  { %v1682_v4 = vpop.permute.xlu0 %1681 }
0x20d5   :  { %2703 = vmatmul.mubr.msk.bf16.vlgmr.msra.gmra.mrb[52].mxu1 %vm466_vm3, %v1682_v4 }
0x20d6   :  { %2715 = vmatpush3.bf16.msra.mxu1 %v3294_v0  ;;  %2718 = vmatprep.mubr.msk.bf16.mxu1 %vm2905_vm1, %v2904_v1 }
0x20d7   :  { %2716 = vmatprep.subr.bf16.mxu1 %v2904_v1 }
0x20da   :  { %2717 = vmatpush3.bf16.msra.mxu1 %v3303_v19 }
0x20db   :  { %2730 = vmatprep.subr.bf16.mxu1 %v2904_v1 }
0x21a8   :  { %v1720_v6 = vpop.f32.mrb[52].mxu1 }
0x21a9   :  { %v1721_v3 = vadd.f32 %v3360_v16, %v1720_v6  ;;  %v2704_v8 = vpop.f32.mrb[53].mxu1 }
0x21aa   :  { %v1723_v10 = vpop.f32.mrb[54].mxu1 }
0x21ab   :  { %1734 = vrot.lane.b32.xlu1 %v1721_v3, %s2906_s1  ;;  %v2705_v12 = vpop.f32.mrb[55].mxu1  ;;  %v1726_v18 = vadd.f32 %v1721_v3, %v1264_v14 }
0x21ad   :  { %v2384_v21 = vmul.f32 -1.442695, %v1726_v18 }
0x21af   :  { %2846 = vpow2.f32 %v2384_v21 }
0x21b9   :  { %v2847_v22 = vpop.eup %2846 }
0x21ba   :  { %v1730_v31 = vadd.f32 1.0, %v2847_v22 }
0x21bc   :  { %2848 = vrcp.f32 %v1730_v31 }
0x21c6   :  { %v2849_v9 = vpop.eup %2848 }
0x221d   :  { %v1735_v24 = vpop.permute.xlu1 %1734 }
0x221e   :  { %v1737_v25 = vmul.f32 %v2849_v9, %v1735_v24 }
0x2220   :  { %1739 = vrot.lane.b32.xlu0 %v1737_v25, %s2906_s1 }
0x2292   :  { %v1740_v26 = vpop.permute.xlu0 %1739 }
0x2293   :  { %v1742_v29 = vadd.f32 %v1740_v26, %v1264_v14 }
0x2295   :  { %2850 = vtanh.f32 %v1742_v29 }
0x229f   :  { %v2851_v30 = vpop.eup %2850 }
0x22a0   :  { %v1744_v20 = vsub.f32 %v1678_v47, %v2851_v30 }
0x22a2   :  { %1746 = vrot.lane.b32.xlu1 %v1744_v20, %s2908_s19 }
0x2314   :  { %v1747_v32 = vpop.permute.xlu1 %1746 }
0x2315   :  { %v1749_v28 = vmul.f32 %v2849_v9, %v1747_v32 }
0x2317   :  { %1751 = vrot.lane.b32.xlu0 %v1749_v28, %s2907_s4 }
0x2389   :  { %v1752_v33 = vpop.permute.xlu0 %1751 }
0x238a   :  { %v1754_v34 = vadd.f32 %v2851_v30, %v1752_v33  ;;  %v1384_v30 = vadd.f32 %v3375_v38, %v3353_v39 }
0x238c   :  { %v1755_v35 = vpack.c.bf16 %v1754_v34, %v1754_v34 }
0x238e   :  { %1757 = vrot.lane.b32.xlu1 %v1755_v35, %s2906_s1 }
0x2400   :  { %v1758_v36 = vpop.permute.xlu1 %1757 }
0x2401   :  { %2711 = vmatmul.mubr.msk.bf16.vlgmr.msra.gmra.mrb[56].mxu0 %vm466_vm3, %v1758_v36 }
0x2402   :  { %2723 = vmatpush3.bf16.msra.mxu0 %v3294_v0  ;;  %2726 = vmatprep.mubr.msk.bf16.mxu0 %vm2905_vm1, %v2904_v1 }
0x2403   :  { %2724 = vmatprep.subr.bf16.mxu0 %v2904_v1 }
0x2406   :  { %2725 = vmatpush3.bf16.msra.mxu0 %v3303_v19 }
0x24d4   :  { %v1796_v41 = vpop.f32.mrb[56].mxu0 }
0x24d5   :  { %v1797_v42 = vadd.f32 %v3360_v16, %v1796_v41  ;;  %v2712_v43 = vpop.f32.mrb[57].mxu0 }
0x24d6   :  { %v1799_v45 = vpop.f32.mrb[58].mxu0 }
0x24d7   :  { %1810 = vrot.lane.b32.xlu0 %v1797_v42, %s2906_s1  ;;  %v2713_v17 = vpop.f32.mrb[59].mxu0  ;;  %v1802_v48 = vadd.f32 %v1797_v42, %v1304_v46 }
0x24d9   :  { %v2386_v49 = vmul.f32 -1.442695, %v1802_v48 }
0x24db   :  { %2852 = vpow2.f32 %v2386_v49 }
0x24e5   :  { %v2853_v50 = vpop.eup %2852 }
0x24e6   :  { %v1806_v37 = vadd.f32 1.0, %v2853_v50 }
0x24e8   :  { %2854 = vrcp.f32 %v1806_v37 }
0x24f2   :  { %v2855_v15 = vpop.eup %2854 }
0x2549   :  { %v1811_v51 = vpop.permute.xlu0 %1810 }
0x254a   :  { %v1813_v52 = vmul.f32 %v2855_v15, %v1811_v51 }
0x254c   :  { %1815 = vrot.lane.b32.xlu1 %v1813_v52, %s2906_s1 }
0x25be   :  { %v1816_v53 = vpop.permute.xlu1 %1815 }
0x25bf   :  { %v1818_v54 = vadd.f32 %v1816_v53, %v1304_v46 }
0x25c1   :  { %2856 = vtanh.f32 %v1818_v54  ;;  %v1431_v54 = vadd.f32 %v3375_v38, %v3404_v13  ;;  %v2393_v38 = vld [vmem:[%s3559_s10] ss:$0 sm:$0xff] }
0x25cb   :  { %v2857_v5 = vpop.eup %2856 }
0x25cc   :  { %v1820_v55 = vsub.f32 %v1754_v34, %v2857_v5 }
0x25ce   :  { %1822 = vrot.lane.b32.xlu0 %v1820_v55, %s2908_s19 }
0x2640   :  { %v1823_v56 = vpop.permute.xlu0 %1822 }
0x2641   :  { %v1825_v44 = vmul.f32 %v2855_v15, %v1823_v56 }
0x2643   :  { %1827 = vrot.lane.b32.xlu1 %v1825_v44, %s2907_s4 }
0x26b5   :  { %v1828_v57 = vpop.permute.xlu1 %1827 }
0x26b6   :  { %v1830_v58 = vadd.f32 %v2857_v5, %v1828_v57 }
0x26b8   :  { %v1831_v23 = vpack.c.bf16 %v1830_v58, %v1830_v58 }
0x26ba   :  { %1833 = vrot.lane.b32.xlu0 %v1831_v23, %s2906_s1 }
0x272c   :  { %v1834_v59 = vpop.permute.xlu0 %1833 }
0x272d   :  { %2719 = vmatmul.mubr.msk.bf16.vlgmr.msra.gmra.mrb[56].mxu1 %vm466_vm3, %v1834_v59 }
0x272e   :  { %2731 = vmatpush3.bf16.msra.mxu1 %v3294_v0  ;;  %2734 = vmatprep.mubr.msk.bf16.mxu1 %vm2905_vm1, %v2904_v1 }
0x272f   :  { %2732 = vmatprep.subr.bf16.mxu1 %v2904_v1 }
0x2732   :  { %2733 = vmatpush3.bf16.msra.mxu1 %v3303_v19 }
0x2800   :  { %v1872_v27 = vpop.f32.mrb[56].mxu1 }
0x2801   :  { %v1873_v60 = vadd.f32 %v3360_v16, %v1872_v27  ;;  %v2720_v61 = vpop.f32.mrb[57].mxu1 }
0x2802   :  { %v1875_v63 = vpop.f32.mrb[58].mxu1 }
0x2803   :  { %1886 = vrot.lane.b32.xlu1 %v1873_v60, %s2906_s1  ;;  %v2721_v2 = vpop.f32.mrb[59].mxu1  ;;  %v1878_v11 = vadd.f32 %v1873_v60, %v1344_v40  ;;  %v2394_v63 = vld [vmem:[%s3560_s11] ss:$0 sm:$0xff] }
0x2804   :  { %v2102_v2 = vld [vmem:[%s3561_s12] sm:$0xff] }
0x2805   :  { %v2388_v0 = vmul.f32 -1.442695, %v1878_v11  ;;  %v2104_v11 = vld [vmem:[%s3561_s12 + $0x10] sm:$0xff] }
0x2807   :  { %2858 = vpow2.f32 %v2388_v0  ;;  %v2909_v0 = vmov 0.0|0.0  }
0x2808   :  { %2758 = vmatprep.subr.bf16.mxu0 %v2909_v0  ;;  %2764 = vmatprep.subr.bf16.mxu1 %v2909_v0 }
0x2811   :  { %v2859_v47 = vpop.eup %2858 }
0x2812   :  { %v1882_v62 = vadd.f32 1.0, %v2859_v47 }
0x2814   :  { %2860 = vrcp.f32 %v1882_v62  ;;  %v2105_v62 = vld [vmem:[%s3561_s12 + $0x18] sm:$0xff] }
0x281e   :  { %v2861_v4 = vpop.eup %2860 }
0x2875   :  { %v1887_v6 = vpop.permute.xlu1 %1886 }
0x2876   :  { %v1889_v19 = vmul.f32 %v2861_v4, %v1887_v6 }
0x2878   :  { %1891 = vrot.lane.b32.xlu0 %v1889_v19, %s2906_s1 }
0x28ea   :  { %v1892_v3 = vpop.permute.xlu0 %1891 }
0x28eb   :  { %v1894_v8 = vadd.f32 %v1892_v3, %v1344_v40  ;;  %v2103_v40 = vld [vmem:[%s3561_s12 + $0x8] sm:$0xff] }
0x28ec   :  { %v2759_v47 = vpack.c.bf16 %v2103_v40, %v2102_v2  ;;  %v2397_v2 = vld [vmem:[%s3563_s14] ss:$0 sm:$0xff]  ;;  %s2880_s14 = scalar_lea.vmem %s2320_s8, 32 }
0x28ed   :  { %2862 = vtanh.f32 %v1894_v8  ;;  %p2881_p0 = scmp.ne.s32.totalorder %s2320_s8, %s2880_s14  ;;  %p2886_p2 = scmp.lt.s32.totalorder %s2880_s14, %s2880_s14 }
0x28ef   :  { %p2887_p3 = por %p2886_p2, %p2885_p1 }
0x28f1   :  { %p2888_p4 = pnand %p2887_p3, %p2881_p0 }
0x28f7   :  { %v2863_v10 = vpop.eup %2862 }
0x28f8   :  { %v1896_v12 = vsub.f32 %v1830_v58, %v2863_v10 }
0x28fa   :  { %1898 = vrot.lane.b32.xlu1 %v1896_v12, %s2908_s19 }
0x296c   :  { %v1899_v14 = vpop.permute.xlu1 %1898 }
0x296d   :  { %v1901_v7 = vmul.f32 %v2861_v4, %v1899_v14  ;;  %v2762_v4 = vpack.c.bf16 %v2105_v62, %v2104_v11  ;;  %v2398_v11 = vld [vmem:[%s3564_s15] ss:$0 sm:$0xff] }
0x296e   :  { %v2399_v62 = vld [vmem:[%s3566_s17] ss:$0 sm:$0xff] }
0x296f   :  { %1903 = vrot.lane.b32.xlu0 %v1901_v7, %s2907_s4 }
0x29e1   :  { %v1904_v18 = vpop.permute.xlu0 %1903 }
0x29e2   :  { %v1906_v21 = vadd.f32 %v2863_v10, %v1904_v18 }
0x29e4   :  { %v1907_v22 = vpack.c.bf16 %v1906_v21, %v1906_v21 }
0x29e6   :  { %1909 = vrot.lane.b32.xlu1 %v1907_v22, %s2906_s1 }
0x2a58   :  { %v1910_v31 = vpop.permute.xlu1 %1909 }
0x2a59   :  { %2727 = vmatmul.mubr.msk.bf16.vlgmr.msra.gmra.mrb[60].mxu0 %vm466_vm3, %v1910_v31 }
0x2a5a   :  { %2746 = vmatprep.mubr.msk.f32.mxu0 %vm2905_vm1, %v2904_v1  ;;  %2760 = vmatpush3.bf16.msra.mxu0 %v2759_v47 }
0x2a5b   :  { %2761 = vmatprep.subr.bf16.mxu0 %v2909_v0 }
0x2a5e   :  { %2763 = vmatpush3.bf16.msra.mxu0 %v2762_v4 }
0x2b2c   :  { %v1948_v9 = vpop.f32.mrb[60].mxu0 }
0x2b2d   :  { %v1949_v24 = vadd.f32 %v3360_v16, %v1948_v9  ;;  %v2728_v25 = vpop.f32.mrb[61].mxu0 }
0x2b2e   :  { %v1951_v26 = vpop.f32.mrb[62].mxu0 }
0x2b2f   :  { %1962 = vrot.lane.b32.xlu0 %v1949_v24, %s2906_s1  ;;  %v2729_v29 = vpop.f32.mrb[63].mxu0  ;;  %v1954_v20 = vadd.f32 %v1949_v24, %v1384_v30 }
0x2b31   :  { %v2390_v32 = vmul.f32 -1.442695, %v1954_v20 }
0x2b33   :  { %2864 = vpow2.f32 %v2390_v32 }
0x2b3d   :  { %v2865_v28 = vpop.eup %2864 }
0x2b3e   :  { %v1958_v33 = vadd.f32 1.0, %v2865_v28 }
0x2b40   :  { %2866 = vrcp.f32 %v1958_v33 }
0x2b4a   :  { %v2867_v34 = vpop.eup %2866 }
0x2ba1   :  { %v1963_v35 = vpop.permute.xlu0 %1962 }
0x2ba2   :  { %v1965_v36 = vmul.f32 %v2867_v34, %v1963_v35 }
0x2ba4   :  { %1967 = vrot.lane.b32.xlu1 %v1965_v36, %s2906_s1 }
0x2c16   :  { %v1968_v41 = vpop.permute.xlu1 %1967 }
0x2c17   :  { %v1970_v42 = vadd.f32 %v1968_v41, %v1384_v30 }
0x2c19   :  { %2868 = vtanh.f32 %v1970_v42 }
0x2c23   :  { %v2869_v43 = vpop.eup %2868 }
0x2c24   :  { %v1972_v45 = vsub.f32 %v1906_v21, %v2869_v43 }
0x2c26   :  { %1974 = vrot.lane.b32.xlu0 %v1972_v45, %s2908_s19  ;;  %v2227_v45 = vld [vmem:[%s3565_s16] sm:$0xff] }
0x2c98   :  { %v1975_v17 = vpop.permute.xlu0 %1974 }
0x2c99   :  { %v1977_v39 = vmul.f32 %v2867_v34, %v1975_v17  ;;  %v2228_v17 = vld [vmem:[%s3565_s16 + $0x8] sm:$0xff] }
0x2c9b   :  { %1979 = vrot.lane.b32.xlu1 %v1977_v39, %s2907_s4  ;;  %v2765_v39 = vpack.c.bf16 %v2228_v17, %v2227_v45 }
0x2d0d   :  { %v1980_v46 = vpop.permute.xlu1 %1979 }
0x2d0e   :  { %v1982_v48 = vadd.f32 %v2869_v43, %v1980_v46  ;;  %v2229_v46 = vld [vmem:[%s3565_s16 + $0x10] sm:$0xff] }
0x2d10   :  { %v1983_v49 = vpack.c.bf16 %v1982_v48, %v1982_v48 }
0x2d12   :  { %1985 = vrot.lane.b32.xlu0 %v1983_v49, %s2906_s1 }
0x2d84   :  { %v1986_v50 = vpop.permute.xlu0 %1985 }
0x2d85   :  { %2735 = vmatmul.mubr.msk.bf16.vlgmr.msra.gmra.mrb[60].mxu1 %vm466_vm3, %v1986_v50 }
0x2d86   :  { %2755 = vmatprep.mubr.msk.f32.mxu1 %vm2905_vm1, %v2904_v1  ;;  %2766 = vmatpush3.bf16.msra.mxu1 %v2765_v39 }
0x2d87   :  { %2753 = vmatprep.subr.mxu1 %v2904_v1 }
0x2d8a   :  { %2754 = vmatpush3.msra.mxu1 %v2229_v46 }
0x2e58   :  { %v2024_v37 = vpop.f32.mrb[60].mxu1 }
0x2e59   :  { %v2025_v15 = vadd.f32 %v3360_v16, %v2024_v37  ;;  %v2736_v51 = vpop.f32.mrb[61].mxu1 }
0x2e5a   :  { %v2027_v52 = vpop.f32.mrb[62].mxu1 }
0x2e5b   :  { %2038 = vrot.lane.b32.xlu1 %v2025_v15, %s2906_s1  ;;  %v2737_v53 = vpop.f32.mrb[63].mxu1  ;;  %v2030_v5 = vadd.f32 %v2025_v15, %v1431_v54 }
0x2e5d   :  { %v2392_v55 = vmul.f32 -1.442695, %v2030_v5 }
0x2e5f   :  { %2870 = vpow2.f32 %v2392_v55 }
0x2e69   :  { %v2871_v56 = vpop.eup %2870 }
0x2e6a   :  { %v2034_v44 = vadd.f32 1.0, %v2871_v56 }
0x2e6c   :  { %2872 = vrcp.f32 %v2034_v44 }
0x2e76   :  { %v2873_v57 = vpop.eup %2872 }
0x2ecd   :  { %v2039_v58 = vpop.permute.xlu1 %2038 }
0x2ece   :  { %v2041_v23 = vmul.f32 %v2873_v57, %v2039_v58 }
0x2ed0   :  { %2043 = vrot.lane.b32.xlu0 %v2041_v23, %s2906_s1 }
0x2f42   :  { %v2044_v16 = vpop.permute.xlu0 %2043 }
0x2f43   :  { %v2046_v59 = vadd.f32 %v2044_v16, %v1431_v54 }
0x2f45   :  { %2874 = vtanh.f32 %v2046_v59 }
0x2f4f   :  { %v2875_v27 = vpop.eup %2874 }
0x2f50   :  { %v2048_v60 = vsub.f32 %v1982_v48, %v2875_v27  ;;  %v2395_v48 = vld [vmem:[%s3562_s13] ss:$0 sm:$0xff] }
0x2f52   :  { %2050 = vrot.lane.b32.xlu1 %v2048_v60, %s2908_s19 }
0x2f56   :  { %2088 = vrot.lane.b32.xlu1 %v2393_v38, %s2906_s1 }
0x2fc4   :  { %v2051_v13 = vpop.permute.xlu1 %2050 }
0x2fc5   :  { %v2053_v61 = vmul.f32 %v2873_v57, %v2051_v13 }
0x2fc7   :  { %2055 = vrot.lane.b32.xlu0 %v2053_v61, %s2907_s4 }
0x2fc8   :  { %v2089_v34 = vpop.permute.xlu1 %2088 }
0x2fcb   :  { %2098 = vrot.lane.b32.xlu0 %v2394_v63, %s2906_s1 }
0x3039   :  { %v2056_v6 = vpop.permute.xlu0 %2055 }
0x303a   :  { %v2058_v19 = vadd.f32 %v2875_v27, %v2056_v6 }
0x303c   :  { %v2060_v3 = vsel %vm2059_vm4, %v2058_v19, 0.0 }
0x303d   :  { %v2061_v8 = vrot.slane %v2060_v3, 4  ;;  %v2099_v36 = vpop.permute.xlu0 %2098 }
0x303f   :  { %v2062_v10 = vadd.f32 %v2061_v8, %v2060_v3 }
0x3041   :  { %v2063_v12 = vrot.slane %v2062_v10, 2 }
0x3043   :  { %v2064_v14 = vadd.f32 %v2063_v12, %v2062_v10 }
0x3045   :  { %v2065_v7 = vrot.slane %v2064_v14, 1 }
0x3047   :  { %v2066_v18 = vadd.f32 %v2065_v7, %v2064_v14 }
0x3049   :  { %v2068_v21 = vmul.f32 0.5, %v2066_v18 }
0x304b   :  { %v2069_v22 = vsub.f32 %v2058_v19, %v2068_v21 }
0x304d   :  { %v2070_v31 = vmul.f32 %v2069_v22, %v2069_v22 }
0x304f   :  { %v2071_v9 = vsel %vm2059_vm4, %v2070_v31, 0.0 }
0x3050   :  { %v2072_v24 = vrot.slane %v2071_v9, 4 }
0x3052   :  { %v2073_v25 = vadd.f32 %v2072_v24, %v2071_v9 }
0x3054   :  { %v2074_v26 = vrot.slane %v2073_v25, 2 }
0x3056   :  { %v2075_v29 = vadd.f32 %v2074_v26, %v2073_v25 }
0x3058   :  { %v2076_v30 = vrot.slane %v2075_v29, 1 }
0x305a   :  { %v2077_v20 = vadd.f32 %v2076_v30, %v2075_v29 }
0x305c   :  { %v2078_v32 = vmul.f32 0.5, %v2077_v20 }
0x305e   :  { %v2079_v28 = vadd.f32 1e-05, %v2078_v32 }
0x3060   :  { %2876 = vrsqrt.f32 %v2079_v28 }
0x306a   :  { %v2877_v33 = vpop.eup %2876 }
0x306b   :  { %v2081_v35 = vmul.f32 %v2877_v33, %v2069_v22 }
0x306d   :  { %v2091_v41 = vmul.f32 %v2089_v34, %v2081_v35 }
0x306f   :  { %v2101_v42 = vadd.f32 %v2099_v36, %v2091_v41 }
0x3071   :  { %2114 = vrot.lane.b32.xlu1 %v2101_v42, %s2906_s1 }
0x30e3   :  { %v2115_v43 = vpop.permute.xlu1 %2114 }
0x30e4   :  { %2747 = vmatmul.mubr.msk.f32.vlgmr.msra.gmra.mrb[64].mxu0 %vm466_vm3, %v2115_v43 }
0x31b7   :  { %v2184_v49 = vpop.f32.mrb[64].mxu0 }
0x31b8   :  { %v2185_v50 = vadd.f32 %v2395_v48, %v2184_v49  ;;  %v2748_v37 = vpop.f32.mrb[65].mxu0 }
0x31ba   :  { %v2188_v15 = vmax.f32 %v2185_v50, 0.0 }
0x31bc   :  { %v2190_v51 = vsel %vm2189_vm5, %v2188_v15, 0.0 }
0x31bd   :  { %v2191_v52 = vrot.slane %v2190_v51, 4 }
0x31bf   :  { %v2192_v53 = vadd.f32 %v2191_v52, %v2190_v51 }
0x31c1   :  { %v2193_v54 = vrot.slane %v2192_v53, 2 }
0x31c3   :  { %v2194_v5 = vadd.f32 %v2193_v54, %v2192_v53 }
0x31c5   :  { %v2195_v1 = vrot.slane %v2194_v5, 1 }
0x31c7   :  { %v2196_v55 = vadd.f32 %v2195_v1, %v2194_v5 }
0x31c9   :  { %v2197_v56 = vmul.f32 0.5, %v2196_v55 }
0x31cb   :  { %v2198_v44 = vsub.f32 %v2188_v15, %v2197_v56 }
0x31cd   :  { %v2199_v57 = vmul.f32 %v2198_v44, %v2198_v44 }
0x31cf   :  { %v2200_v58 = vsel %vm2189_vm5, %v2199_v57, 0.0 }
0x31d0   :  { %v2201_v23 = vrot.slane %v2200_v58, 4 }
0x31d2   :  { %v2202_v16 = vadd.f32 %v2201_v23, %v2200_v58 }
0x31d4   :  { %v2203_v59 = vrot.slane %v2202_v16, 2 }
0x31d6   :  { %v2204_v27 = vadd.f32 %v2203_v59, %v2202_v16 }
0x31d8   :  { %v2205_v60 = vrot.slane %v2204_v27, 1 }
0x31da   :  { %v2206_v38 = vadd.f32 %v2205_v60, %v2204_v27 }
0x31dc   :  { %v2207_v13 = vmul.f32 0.5, %v2206_v38 }
0x31de   :  { %v2208_v61 = vadd.f32 1e-05, %v2207_v13 }
0x31e0   :  { %2878 = vrsqrt.f32 %v2208_v61 }
0x31ea   :  { %v2879_v63 = vpop.eup %2878 }
0x31eb   :  { %v2210_v40 = vmul.f32 %v2879_v63, %v2198_v44 }
0x31ed   :  { %v2218_v0 = vmul.f32 %v2397_v2, %v2210_v40 }
0x31ef   :  { %v2226_v47 = vadd.f32 %v2398_v11, %v2218_v0 }
0x31f1   :  { %2756 = vmatmul.mubr.msk.f32.vlgmr.msra.gmra.mrb[64].mxu1 %vm2237_vm6, %v2226_v47 }
0x32c4   :  { %v2307_v4 = vpop.f32.mrb[64].mxu1 }
0x32c5   :  { %v2308_v6 = vadd.f32 %v2399_v62, %v2307_v4  ;;  %v2757_v19 = vpop.f32.mrb[65].mxu1 }
0x32c7   :  { %2312 = vst.msk [vmem:[#allocation2] sm:$0x3] %vm2311_vm7, %v2308_v6 }
0x32c8   :  { %2891 = shalt.err (!%p2888_p4)
}
0x32c9   :  { %s2892_s25 = scalar_lea.hbm %s3567_s18, 32 }
0x32ca   :  { %p2893_p5 = scmp.ne.s32.totalorder %s3567_s18, %s2892_s25  ;;  %p2896_p6 = scmp.lt.u32.totalorder %s2892_s25, %s3567_s18 }
0x32cc   :  { %p2898_p7 = pnand %p2896_p6, %p2893_p5 }
0x32ce   :  { %2901 = shalt.err (!%p2898_p7)
}
0x32cf   :  { %2322 = dma.vmem_to_hbm [thread:$0]  %s2320_s8, 32, %s3567_s18, [#allocation3]  }
0x32d0   :  { %2902 = dma.done.wait [#allocation3], 32  }
0x32d1   :  { %2903 = vsyncadd [#allocation3], 4294967264 }
0x32d2   :  { %2326 = vsyncpa [#allocation3], 1 }

</bundles_post_ra>
